<compile_context>
chip_gen: v7x
topology: tpu7x:2x2x1
jax: 0.10.0
libtpu: 0.0.40
codegen_flags: <defaults>
</compile_context>

<pallas_src>
import functools

import jax
import jax.numpy as jnp
import numpy as np
from jax.experimental import pallas as pl
from jax.experimental.pallas import tpu as pltpu


def residual_stack_kernel(x_ref, wd0_ref, wd1_ref, wts_ref, bts_ref,
                          wrk_ref, brk_ref, out_ref, *,
                          dilations, skip_size, cd, cs):
    """Fused ResidualStack forward for one batch element (grid axis = batch).

    x_ref:   [1, Cr, T]              input, NCL, time on lanes (right-aligned)
    wd0/wd1: [n_blocks, Cr, Cr]      dilated-conv taps (kernel_size=2, no bias)
    wts:     [n_blocks, 2*Cd, Cr]    tanh|sigmoid 1x1 conv weights (concat on Cout)
    bts:     [n_blocks, 2*Cd, 1]     tanh|sigmoid biases
    wrk:     [n_blocks, Cs+Cr, Cd]   skip|residual 1x1 conv weights (concat on Cout)
    brk:     [n_blocks, Cs+Cr, 1]    skip|residual biases
    out_ref: [1, Cs, skip_size]      accumulated skip sum (res_sum)
    """
    out = x_ref[0]                      # [Cr, T]; valid data is right-aligned
    t = out.shape[-1]
    res_sum = jnp.zeros((cs, skip_size), jnp.float32)

    for i, d in enumerate(dilations):   # static unroll over residual blocks
        # Dilated causal conv (k=2): y[p] = wd0 @ out[p-d] + wd1 @ out[p].
        # Right alignment => the x[p-d] tap is a lane rotation (XLU), not an
        # unaligned slice; wrap-around only touches the invalid (left) region.
        x_prev = pltpu.roll(out, shift=d, axis=1)
        y = (jnp.dot(wd0_ref[i], x_prev, preferred_element_type=jnp.float32) +
             jnp.dot(wd1_ref[i], out, preferred_element_type=jnp.float32))

        # Fused tanh|sigmoid 1x1 convs -> gated activation unit.
        z = jnp.dot(wts_ref[i], y, preferred_element_type=jnp.float32) + bts_ref[i]
        gated = jnp.tanh(z[:cd, :]) * jax.nn.sigmoid(z[cd:, :])

        # Fused skip|residual 1x1 convs (one matmul for both outputs).
        rk = jnp.dot(wrk_ref[i], gated, preferred_element_type=jnp.float32) + brk_ref[i]

        # Skip path: last skip_size timesteps, accumulated in VMEM.
        res_sum = res_sum + rk[:cs, t - skip_size:]
        # Residual path: 1x1 conv + (right-aligned) cropped input == `out`.
        out = rk[cs:, :] + out

    out_ref[0] = res_sum


def pack_params(params):
    """Stack per-block torch-shaped weights into block-indexed arrays and fuse
    the parallel 1x1 convs (tanh|sigmoid and skip|residual)."""
    dilations = tuple(int(p["dilation"]) for p in params)
    wd0 = jnp.stack([p["wd"][:, :, 0] for p in params])                        # [n,Cr,Cr]
    wd1 = jnp.stack([p["wd"][:, :, 1] for p in params])                        # [n,Cr,Cr]
    wts = jnp.stack([jnp.concatenate([p["wt"], p["ws"]], 0) for p in params])  # [n,2Cd,Cr]
    bts = jnp.stack([jnp.concatenate([p["bt"], p["bs"]], 0)[:, None]
                     for p in params])                                         # [n,2Cd,1]
    wrk = jnp.stack([jnp.concatenate([p["wk"], p["wr"]], 0) for p in params])  # [n,Cs+Cr,Cd]
    brk = jnp.stack([jnp.concatenate([p["bk"], p["br"]], 0)[:, None]
                     for p in params])                                         # [n,Cs+Cr,1]
    packed = dict(wd0=wd0, wd1=wd1, wts=wts, bts=bts, wrk=wrk, brk=brk)
    return packed, dilations


def residual_stack_forward(x_ncl, packed, *, dilations, skip_size):
    """ResidualStack.forward. x_ncl: [B, Cr, T] (NCL). Returns [B, Cs, skip_size]."""
    b, cr, t = x_ncl.shape
    n, two_cd, _ = packed["wts"].shape
    cd = two_cd // 2
    cs = packed["wrk"].shape[1] - cr
    # Same requirement as the PyTorch module: final output length >= skip_size.
    assert t - sum(dilations) >= skip_size, "skip_size exceeds final output length"

    kernel = functools.partial(residual_stack_kernel, dilations=dilations,
                               skip_size=skip_size, cd=cd, cs=cs)
    const = lambda i: (0, 0, 0)
    return pl.pallas_call(
        kernel,
        out_shape=jax.ShapeDtypeStruct((b, cs, skip_size), jnp.float32),
        grid=(b,),                                   # batch -> parallel (2 TCs on v7x)
        in_specs=[
            pl.BlockSpec((1, cr, t), lambda i: (i, 0, 0)),   # x
            pl.BlockSpec((n, cr, cr), const),                # wd0
            pl.BlockSpec((n, cr, cr), const),                # wd1
            pl.BlockSpec((n, 2 * cd, cr), const),            # wts
            pl.BlockSpec((n, 2 * cd, 1), const),             # bts
            pl.BlockSpec((n, cs + cr, cd), const),           # wrk
            pl.BlockSpec((n, cs + cr, 1), const),            # brk
        ],
        out_specs=pl.BlockSpec((1, cs, skip_size), lambda i: (i, 0, 0)),
        compiler_params=pltpu.CompilerParams(
            dimension_semantics=("parallel",)),
    )(x_ncl, packed["wd0"], packed["wd1"], packed["wts"], packed["bts"],
      packed["wrk"], packed["brk"])


def init_params(key, layer_size, stack_size, cr, cd, cs):
    """Deterministic synthetic parameters, shapes mirroring the torch module."""
    dilations = [2 ** i for i in range(layer_size)] * stack_size
    params = []
    s = 0.3
    for i, d in enumerate(dilations):
        ks = jax.random.split(jax.random.fold_in(key, i), 9)
        params.append(dict(
            dilation=d,
            wd=s * jax.random.normal(ks[0], (cr, cr, 2), jnp.float32),  # Conv1d(Cr,Cr,2) OIK
            wt=s * jax.random.normal(ks[1], (cd, cr), jnp.float32),     # Conv1d(Cr,Cd,1)
            bt=s * jax.random.normal(ks[2], (cd,), jnp.float32),
            ws=s * jax.random.normal(ks[3], (cd, cr), jnp.float32),     # Conv1d(Cr,Cd,1)
            bs=s * jax.random.normal(ks[4], (cd,), jnp.float32),
            wr=s * jax.random.normal(ks[5], (cr, cd), jnp.float32),     # Conv1d(Cd,Cr,1)
            br=s * jax.random.normal(ks[6], (cr,), jnp.float32),
            wk=s * jax.random.normal(ks[7], (cs, cd), jnp.float32),     # Conv1d(Cd,Cs,1)
            bk=s * jax.random.normal(ks[8], (cs,), jnp.float32),
        ))
    return params


def ref_forward(x_ncl, params, skip_size):
    """Plain-JAX reference replicating the PyTorch forward semantics (NCL)."""
    hp = jax.lax.Precision.HIGHEST
    out = x_ncl
    res_sum = 0.0
    for p in params:
        d = p["dilation"]
        t_out = out.shape[-1] - d
        y = (jnp.einsum("oi,bit->bot", p["wd"][:, :, 0], out[:, :, :t_out], precision=hp)
             + jnp.einsum("oi,bit->bot", p["wd"][:, :, 1], out[:, :, d:], precision=hp))
        gt = jnp.tanh(jnp.einsum("oi,bit->bot", p["wt"], y, precision=hp)
                      + p["bt"][None, :, None])
        gs = jax.nn.sigmoid(jnp.einsum("oi,bit->bot", p["ws"], y, precision=hp)
                            + p["bs"][None, :, None])
        gated = gt * gs
        new_out = (jnp.einsum("oi,bit->bot", p["wr"], gated, precision=hp)
                   + p["br"][None, :, None] + out[:, :, -t_out:])
        skip = (jnp.einsum("oi,bit->bot", p["wk"], gated, precision=hp)
                + p["bk"][None, :, None])
        res_sum = res_sum + skip[:, :, -skip_size:]
        out = new_out
    return res_sum


if __name__ == "__main__":
    layer_size, stack_size = 3, 2
    residual_channels, dilation_channels, skip_channels = 4, 8, 16
    batch, seq_len, skip_size = 2, 128, 64   # sum(dilations)=14 -> final length 114 >= 64

    key = jax.random.PRNGKey(0)
    kx, kp = jax.random.split(key)
    x = jax.random.normal(kx, (batch, residual_channels, seq_len), jnp.float32)  # NCL
    params = init_params(kp, layer_size, stack_size,
                         residual_channels, dilation_channels, skip_channels)

    packed, dilations = pack_params(params)
    fwd = jax.jit(functools.partial(residual_stack_forward,
                                    dilations=dilations, skip_size=skip_size))
    res_sum = jax.block_until_ready(fwd(x, packed))
    assert res_sum.shape == (batch, skip_channels, skip_size)

    ref = ref_forward(x, params, skip_size)
    np.testing.assert_allclose(np.asarray(res_sum), np.asarray(ref),
                               rtol=5e-4, atol=5e-4)
    print("KERNEL_OK")
</pallas_src>

<mosaic_0001>
module attributes {stable_mosaic.version = 11 : i64} {
  func.func @residual_stack_kernel(%arg0: i32, %arg1: memref<1x4x128xf32, #tpu.memory_space<vmem>>, %arg2: memref<6x4x4xf32, #tpu.memory_space<vmem>>, %arg3: memref<6x4x4xf32, #tpu.memory_space<vmem>>, %arg4: memref<6x16x4xf32, #tpu.memory_space<vmem>>, %arg5: memref<6x16x1xf32, #tpu.memory_space<vmem>>, %arg6: memref<6x20x8xf32, #tpu.memory_space<vmem>>, %arg7: memref<6x20x1xf32, #tpu.memory_space<vmem>>, %arg8: memref<1x16x64xf32, #tpu.memory_space<vmem>>) attributes {dimension_semantics = [#tpu.dimension_semantics<parallel>], iteration_bounds = array<i64: 2>, scalar_prefetch = 0 : i64, scratch_operands = 0 : i64, tpu.core_type = #tpu.core_type<tc>, window_params = [{transform_indices = @transform_0, window_bounds = array<i64: 1, 4, 128>}, {pipeline_mode = #tpu.pipeline_mode<synchronous>, transform_indices = @transform_1, window_bounds = array<i64: 6, 4, 4>}, {pipeline_mode = #tpu.pipeline_mode<synchronous>, transform_indices = @transform_2, window_bounds = array<i64: 6, 4, 4>}, {pipeline_mode = #tpu.pipeline_mode<synchronous>, transform_indices = @transform_3, window_bounds = array<i64: 6, 16, 4>}, {pipeline_mode = #tpu.pipeline_mode<synchronous>, transform_indices = @transform_4, window_bounds = array<i64: 6, 16, 1>}, {pipeline_mode = #tpu.pipeline_mode<synchronous>, transform_indices = @transform_5, window_bounds = array<i64: 6, 20, 8>}, {pipeline_mode = #tpu.pipeline_mode<synchronous>, transform_indices = @transform_6, window_bounds = array<i64: 6, 20, 1>}, {transform_indices = @transform_7, window_bounds = array<i64: 1, 16, 64>}]} {
    %c0 = arith.constant 0 : index
    %c0_0 = arith.constant 0 : index
    %c0_1 = arith.constant 0 : index
    %0 = vector.load %arg1[%c0, %c0_0, %c0_1] : memref<1x4x128xf32, #tpu.memory_space<vmem>>, vector<1x4x128xf32>
    %1 = vector.shape_cast %0 : vector<1x4x128xf32> to vector<4x128xf32>
    %cst = arith.constant 0.000000e+00 : f32
    %2 = vector.broadcast %cst : f32 to vector<16x64xf32>
    %c1_i32 = arith.constant 1 : i32
    %3 = tpu.dynamic_rotate %1 by %c1_i32 dim 1 : vector<4x128xf32>, i32 -> vector<4x128xf32>
    %c0_2 = arith.constant 0 : index
    %c0_3 = arith.constant 0 : index
    %c0_4 = arith.constant 0 : index
    %4 = vector.load %arg2[%c0_2, %c0_3, %c0_4] : memref<6x4x4xf32, #tpu.memory_space<vmem>>, vector<1x4x4xf32>
    %5 = vector.shape_cast %4 : vector<1x4x4xf32> to vector<4x4xf32>
    %cst_5 = arith.constant dense<0.000000e+00> : vector<4x128xf32>
    %6 = tpu.matmul %5, %3, %cst_5 {dimension_numbers = #tpu.dot_dimension_numbers<[1], [0], [0], [1], [0, 0, 1, 1], [], []>} : vector<4x4xf32>, vector<4x128xf32>, vector<4x128xf32> -> vector<4x128xf32>
    %c0_6 = arith.constant 0 : index
    %c0_7 = arith.constant 0 : index
    %c0_8 = arith.constant 0 : index
    %7 = vector.load %arg3[%c0_6, %c0_7, %c0_8] : memref<6x4x4xf32, #tpu.memory_space<vmem>>, vector<1x4x4xf32>
    %8 = vector.shape_cast %7 : vector<1x4x4xf32> to vector<4x4xf32>
    %cst_9 = arith.constant dense<0.000000e+00> : vector<4x128xf32>
    %9 = tpu.matmul %8, %1, %cst_9 {dimension_numbers = #tpu.dot_dimension_numbers<[1], [0], [0], [1], [0, 0, 1, 1], [], []>} : vector<4x4xf32>, vector<4x128xf32>, vector<4x128xf32> -> vector<4x128xf32>
    %10 = arith.addf %6, %9 : vector<4x128xf32>
    %c0_10 = arith.constant 0 : index
    %c0_11 = arith.constant 0 : index
    %c0_12 = arith.constant 0 : index
    %11 = vector.load %arg4[%c0_10, %c0_11, %c0_12] : memref<6x16x4xf32, #tpu.memory_space<vmem>>, vector<1x16x4xf32>
    %12 = vector.shape_cast %11 : vector<1x16x4xf32> to vector<16x4xf32>
    %cst_13 = arith.constant dense<0.000000e+00> : vector<16x128xf32>
    %13 = tpu.matmul %12, %10, %cst_13 {dimension_numbers = #tpu.dot_dimension_numbers<[1], [0], [0], [1], [0, 0, 1, 1], [], []>} : vector<16x4xf32>, vector<4x128xf32>, vector<16x128xf32> -> vector<16x128xf32>
    %c0_14 = arith.constant 0 : index
    %c0_15 = arith.constant 0 : index
    %c0_16 = arith.constant 0 : index
    %14 = vector.load %arg5[%c0_14, %c0_15, %c0_16] : memref<6x16x1xf32, #tpu.memory_space<vmem>>, vector<1x16x1xf32>
    %15 = vector.shape_cast %14 : vector<1x16x1xf32> to vector<16x1xf32>
    %16 = vector.broadcast %15 : vector<16x1xf32> to vector<16x128xf32>
    %17 = arith.addf %13, %16 : vector<16x128xf32>
    %18 = vector.extract_strided_slice %17 {offsets = [0, 0], sizes = [8, 128], strides = [1, 1]} : vector<16x128xf32> to vector<8x128xf32>
    %19 = math.tanh %18 : vector<8x128xf32>
    %20 = vector.extract_strided_slice %17 {offsets = [8, 0], sizes = [8, 128], strides = [1, 1]} : vector<16x128xf32> to vector<8x128xf32>
    %21 = arith.negf %20 : vector<8x128xf32>
    %22 = math.exp %21 : vector<8x128xf32>
    %cst_17 = arith.constant 1.000000e+00 : f32
    %23 = vector.broadcast %cst_17 : f32 to vector<8x128xf32>
    %24 = arith.addf %23, %22 : vector<8x128xf32>
    %25 = arith.divf %23, %24 : vector<8x128xf32>
    %26 = arith.mulf %19, %25 : vector<8x128xf32>
    %c0_18 = arith.constant 0 : index
    %c0_19 = arith.constant 0 : index
    %c0_20 = arith.constant 0 : index
    %27 = vector.load %arg6[%c0_18, %c0_19, %c0_20] : memref<6x20x8xf32, #tpu.memory_space<vmem>>, vector<1x20x8xf32>
    %28 = vector.shape_cast %27 : vector<1x20x8xf32> to vector<20x8xf32>
    %cst_21 = arith.constant dense<0.000000e+00> : vector<20x128xf32>
    %29 = tpu.matmul %28, %26, %cst_21 {dimension_numbers = #tpu.dot_dimension_numbers<[1], [0], [0], [1], [0, 0, 1, 1], [], []>} : vector<20x8xf32>, vector<8x128xf32>, vector<20x128xf32> -> vector<20x128xf32>
    %c0_22 = arith.constant 0 : index
    %c0_23 = arith.constant 0 : index
    %c0_24 = arith.constant 0 : index
    %30 = vector.load %arg7[%c0_22, %c0_23, %c0_24] : memref<6x20x1xf32, #tpu.memory_space<vmem>>, vector<1x20x1xf32>
    %31 = vector.shape_cast %30 : vector<1x20x1xf32> to vector<20x1xf32>
    %32 = vector.broadcast %31 : vector<20x1xf32> to vector<20x128xf32>
    %33 = arith.addf %29, %32 : vector<20x128xf32>
    %34 = vector.extract_strided_slice %33 {offsets = [0, 64], sizes = [16, 64], strides = [1, 1]} : vector<20x128xf32> to vector<16x64xf32>
    %35 = arith.addf %2, %34 : vector<16x64xf32>
    %36 = vector.extract_strided_slice %33 {offsets = [16, 0], sizes = [4, 128], strides = [1, 1]} : vector<20x128xf32> to vector<4x128xf32>
    %37 = arith.addf %36, %1 : vector<4x128xf32>
    %c2_i32 = arith.constant 2 : i32
    %38 = tpu.dynamic_rotate %37 by %c2_i32 dim 1 : vector<4x128xf32>, i32 -> vector<4x128xf32>
    %c1 = arith.constant 1 : index
    %c0_25 = arith.constant 0 : index
    %c0_26 = arith.constant 0 : index
    %39 = vector.load %arg2[%c1, %c0_25, %c0_26] : memref<6x4x4xf32, #tpu.memory_space<vmem>>, vector<1x4x4xf32>
    %40 = vector.shape_cast %39 : vector<1x4x4xf32> to vector<4x4xf32>
    %cst_27 = arith.constant dense<0.000000e+00> : vector<4x128xf32>
    %41 = tpu.matmul %40, %38, %cst_27 {dimension_numbers = #tpu.dot_dimension_numbers<[1], [0], [0], [1], [0, 0, 1, 1], [], []>} : vector<4x4xf32>, vector<4x128xf32>, vector<4x128xf32> -> vector<4x128xf32>
    %c1_28 = arith.constant 1 : index
    %c0_29 = arith.constant 0 : index
    %c0_30 = arith.constant 0 : index
    %42 = vector.load %arg3[%c1_28, %c0_29, %c0_30] : memref<6x4x4xf32, #tpu.memory_space<vmem>>, vector<1x4x4xf32>
    %43 = vector.shape_cast %42 : vector<1x4x4xf32> to vector<4x4xf32>
    %cst_31 = arith.constant dense<0.000000e+00> : vector<4x128xf32>
    %44 = tpu.matmul %43, %37, %cst_31 {dimension_numbers = #tpu.dot_dimension_numbers<[1], [0], [0], [1], [0, 0, 1, 1], [], []>} : vector<4x4xf32>, vector<4x128xf32>, vector<4x128xf32> -> vector<4x128xf32>
    %45 = arith.addf %41, %44 : vector<4x128xf32>
    %c1_32 = arith.constant 1 : index
    %c0_33 = arith.constant 0 : index
    %c0_34 = arith.constant 0 : index
    %46 = vector.load %arg4[%c1_32, %c0_33, %c0_34] : memref<6x16x4xf32, #tpu.memory_space<vmem>>, vector<1x16x4xf32>
    %47 = vector.shape_cast %46 : vector<1x16x4xf32> to vector<16x4xf32>
    %cst_35 = arith.constant dense<0.000000e+00> : vector<16x128xf32>
    %48 = tpu.matmul %47, %45, %cst_35 {dimension_numbers = #tpu.dot_dimension_numbers<[1], [0], [0], [1], [0, 0, 1, 1], [], []>} : vector<16x4xf32>, vector<4x128xf32>, vector<16x128xf32> -> vector<16x128xf32>
    %c1_36 = arith.constant 1 : index
    %c0_37 = arith.constant 0 : index
    %c0_38 = arith.constant 0 : index
    %49 = vector.load %arg5[%c1_36, %c0_37, %c0_38] : memref<6x16x1xf32, #tpu.memory_space<vmem>>, vector<1x16x1xf32>
    %50 = vector.shape_cast %49 : vector<1x16x1xf32> to vector<16x1xf32>
    %51 = vector.broadcast %50 : vector<16x1xf32> to vector<16x128xf32>
    %52 = arith.addf %48, %51 : vector<16x128xf32>
    %53 = vector.extract_strided_slice %52 {offsets = [0, 0], sizes = [8, 128], strides = [1, 1]} : vector<16x128xf32> to vector<8x128xf32>
    %54 = math.tanh %53 : vector<8x128xf32>
    %55 = vector.extract_strided_slice %52 {offsets = [8, 0], sizes = [8, 128], strides = [1, 1]} : vector<16x128xf32> to vector<8x128xf32>
    %56 = arith.negf %55 : vector<8x128xf32>
    %57 = math.exp %56 : vector<8x128xf32>
    %cst_39 = arith.constant 1.000000e+00 : f32
    %58 = vector.broadcast %cst_39 : f32 to vector<8x128xf32>
    %59 = arith.addf %58, %57 : vector<8x128xf32>
    %60 = arith.divf %58, %59 : vector<8x128xf32>
    %61 = arith.mulf %54, %60 : vector<8x128xf32>
    %c1_40 = arith.constant 1 : index
    %c0_41 = arith.constant 0 : index
    %c0_42 = arith.constant 0 : index
    %62 = vector.load %arg6[%c1_40, %c0_41, %c0_42] : memref<6x20x8xf32, #tpu.memory_space<vmem>>, vector<1x20x8xf32>
    %63 = vector.shape_cast %62 : vector<1x20x8xf32> to vector<20x8xf32>
    %cst_43 = arith.constant dense<0.000000e+00> : vector<20x128xf32>
    %64 = tpu.matmul %63, %61, %cst_43 {dimension_numbers = #tpu.dot_dimension_numbers<[1], [0], [0], [1], [0, 0, 1, 1], [], []>} : vector<20x8xf32>, vector<8x128xf32>, vector<20x128xf32> -> vector<20x128xf32>
    %c1_44 = arith.constant 1 : index
    %c0_45 = arith.constant 0 : index
    %c0_46 = arith.constant 0 : index
    %65 = vector.load %arg7[%c1_44, %c0_45, %c0_46] : memref<6x20x1xf32, #tpu.memory_space<vmem>>, vector<1x20x1xf32>
    %66 = vector.shape_cast %65 : vector<1x20x1xf32> to vector<20x1xf32>
    %67 = vector.broadcast %66 : vector<20x1xf32> to vector<20x128xf32>
    %68 = arith.addf %64, %67 : vector<20x128xf32>
    %69 = vector.extract_strided_slice %68 {offsets = [0, 64], sizes = [16, 64], strides = [1, 1]} : vector<20x128xf32> to vector<16x64xf32>
    %70 = arith.addf %35, %69 : vector<16x64xf32>
    %71 = vector.extract_strided_slice %68 {offsets = [16, 0], sizes = [4, 128], strides = [1, 1]} : vector<20x128xf32> to vector<4x128xf32>
    %72 = arith.addf %71, %37 : vector<4x128xf32>
    %c4_i32 = arith.constant 4 : i32
    %73 = tpu.dynamic_rotate %72 by %c4_i32 dim 1 : vector<4x128xf32>, i32 -> vector<4x128xf32>
    %c2 = arith.constant 2 : index
    %c0_47 = arith.constant 0 : index
    %c0_48 = arith.constant 0 : index
    %74 = vector.load %arg2[%c2, %c0_47, %c0_48] : memref<6x4x4xf32, #tpu.memory_space<vmem>>, vector<1x4x4xf32>
    %75 = vector.shape_cast %74 : vector<1x4x4xf32> to vector<4x4xf32>
    %cst_49 = arith.constant dense<0.000000e+00> : vector<4x128xf32>
    %76 = tpu.matmul %75, %73, %cst_49 {dimension_numbers = #tpu.dot_dimension_numbers<[1], [0], [0], [1], [0, 0, 1, 1], [], []>} : vector<4x4xf32>, vector<4x128xf32>, vector<4x128xf32> -> vector<4x128xf32>
    %c2_50 = arith.constant 2 : index
    %c0_51 = arith.constant 0 : index
    %c0_52 = arith.constant 0 : index
    %77 = vector.load %arg3[%c2_50, %c0_51, %c0_52] : memref<6x4x4xf32, #tpu.memory_space<vmem>>, vector<1x4x4xf32>
    %78 = vector.shape_cast %77 : vector<1x4x4xf32> to vector<4x4xf32>
    %cst_53 = arith.constant dense<0.000000e+00> : vector<4x128xf32>
    %79 = tpu.matmul %78, %72, %cst_53 {dimension_numbers = #tpu.dot_dimension_numbers<[1], [0], [0], [1], [0, 0, 1, 1], [], []>} : vector<4x4xf32>, vector<4x128xf32>, vector<4x128xf32> -> vector<4x128xf32>
    %80 = arith.addf %76, %79 : vector<4x128xf32>
    %c2_54 = arith.constant 2 : index
    %c0_55 = arith.constant 0 : index
    %c0_56 = arith.constant 0 : index
    %81 = vector.load %arg4[%c2_54, %c0_55, %c0_56] : memref<6x16x4xf32, #tpu.memory_space<vmem>>, vector<1x16x4xf32>
    %82 = vector.shape_cast %81 : vector<1x16x4xf32> to vector<16x4xf32>
    %cst_57 = arith.constant dense<0.000000e+00> : vector<16x128xf32>
    %83 = tpu.matmul %82, %80, %cst_57 {dimension_numbers = #tpu.dot_dimension_numbers<[1], [0], [0], [1], [0, 0, 1, 1], [], []>} : vector<16x4xf32>, vector<4x128xf32>, vector<16x128xf32> -> vector<16x128xf32>
    %c2_58 = arith.constant 2 : index
    %c0_59 = arith.constant 0 : index
    %c0_60 = arith.constant 0 : index
    %84 = vector.load %arg5[%c2_58, %c0_59, %c0_60] : memref<6x16x1xf32, #tpu.memory_space<vmem>>, vector<1x16x1xf32>
    %85 = vector.shape_cast %84 : vector<1x16x1xf32> to vector<16x1xf32>
    %86 = vector.broadcast %85 : vector<16x1xf32> to vector<16x128xf32>
    %87 = arith.addf %83, %86 : vector<16x128xf32>
    %88 = vector.extract_strided_slice %87 {offsets = [0, 0], sizes = [8, 128], strides = [1, 1]} : vector<16x128xf32> to vector<8x128xf32>
    %89 = math.tanh %88 : vector<8x128xf32>
    %90 = vector.extract_strided_slice %87 {offsets = [8, 0], sizes = [8, 128], strides = [1, 1]} : vector<16x128xf32> to vector<8x128xf32>
    %91 = arith.negf %90 : vector<8x128xf32>
    %92 = math.exp %91 : vector<8x128xf32>
    %cst_61 = arith.constant 1.000000e+00 : f32
    %93 = vector.broadcast %cst_61 : f32 to vector<8x128xf32>
    %94 = arith.addf %93, %92 : vector<8x128xf32>
    %95 = arith.divf %93, %94 : vector<8x128xf32>
    %96 = arith.mulf %89, %95 : vector<8x128xf32>
    %c2_62 = arith.constant 2 : index
    %c0_63 = arith.constant 0 : index
    %c0_64 = arith.constant 0 : index
    %97 = vector.load %arg6[%c2_62, %c0_63, %c0_64] : memref<6x20x8xf32, #tpu.memory_space<vmem>>, vector<1x20x8xf32>
    %98 = vector.shape_cast %97 : vector<1x20x8xf32> to vector<20x8xf32>
    %cst_65 = arith.constant dense<0.000000e+00> : vector<20x128xf32>
    %99 = tpu.matmul %98, %96, %cst_65 {dimension_numbers = #tpu.dot_dimension_numbers<[1], [0], [0], [1], [0, 0, 1, 1], [], []>} : vector<20x8xf32>, vector<8x128xf32>, vector<20x128xf32> -> vector<20x128xf32>
    %c2_66 = arith.constant 2 : index
    %c0_67 = arith.constant 0 : index
    %c0_68 = arith.constant 0 : index
    %100 = vector.load %arg7[%c2_66, %c0_67, %c0_68] : memref<6x20x1xf32, #tpu.memory_space<vmem>>, vector<1x20x1xf32>
    %101 = vector.shape_cast %100 : vector<1x20x1xf32> to vector<20x1xf32>
    %102 = vector.broadcast %101 : vector<20x1xf32> to vector<20x128xf32>
    %103 = arith.addf %99, %102 : vector<20x128xf32>
    %104 = vector.extract_strided_slice %103 {offsets = [0, 64], sizes = [16, 64], strides = [1, 1]} : vector<20x128xf32> to vector<16x64xf32>
    %105 = arith.addf %70, %104 : vector<16x64xf32>
    %106 = vector.extract_strided_slice %103 {offsets = [16, 0], sizes = [4, 128], strides = [1, 1]} : vector<20x128xf32> to vector<4x128xf32>
    %107 = arith.addf %106, %72 : vector<4x128xf32>
    %c1_i32_69 = arith.constant 1 : i32
    %108 = tpu.dynamic_rotate %107 by %c1_i32_69 dim 1 : vector<4x128xf32>, i32 -> vector<4x128xf32>
    %c3 = arith.constant 3 : index
    %c0_70 = arith.constant 0 : index
    %c0_71 = arith.constant 0 : index
    %109 = vector.load %arg2[%c3, %c0_70, %c0_71] : memref<6x4x4xf32, #tpu.memory_space<vmem>>, vector<1x4x4xf32>
    %110 = vector.shape_cast %109 : vector<1x4x4xf32> to vector<4x4xf32>
    %cst_72 = arith.constant dense<0.000000e+00> : vector<4x128xf32>
    %111 = tpu.matmul %110, %108, %cst_72 {dimension_numbers = #tpu.dot_dimension_numbers<[1], [0], [0], [1], [0, 0, 1, 1], [], []>} : vector<4x4xf32>, vector<4x128xf32>, vector<4x128xf32> -> vector<4x128xf32>
    %c3_73 = arith.constant 3 : index
    %c0_74 = arith.constant 0 : index
    %c0_75 = arith.constant 0 : index
    %112 = vector.load %arg3[%c3_73, %c0_74, %c0_75] : memref<6x4x4xf32, #tpu.memory_space<vmem>>, vector<1x4x4xf32>
    %113 = vector.shape_cast %112 : vector<1x4x4xf32> to vector<4x4xf32>
    %cst_76 = arith.constant dense<0.000000e+00> : vector<4x128xf32>
    %114 = tpu.matmul %113, %107, %cst_76 {dimension_numbers = #tpu.dot_dimension_numbers<[1], [0], [0], [1], [0, 0, 1, 1], [], []>} : vector<4x4xf32>, vector<4x128xf32>, vector<4x128xf32> -> vector<4x128xf32>
    %115 = arith.addf %111, %114 : vector<4x128xf32>
    %c3_77 = arith.constant 3 : index
    %c0_78 = arith.constant 0 : index
    %c0_79 = arith.constant 0 : index
    %116 = vector.load %arg4[%c3_77, %c0_78, %c0_79] : memref<6x16x4xf32, #tpu.memory_space<vmem>>, vector<1x16x4xf32>
    %117 = vector.shape_cast %116 : vector<1x16x4xf32> to vector<16x4xf32>
    %cst_80 = arith.constant dense<0.000000e+00> : vector<16x128xf32>
    %118 = tpu.matmul %117, %115, %cst_80 {dimension_numbers = #tpu.dot_dimension_numbers<[1], [0], [0], [1], [0, 0, 1, 1], [], []>} : vector<16x4xf32>, vector<4x128xf32>, vector<16x128xf32> -> vector<16x128xf32>
    %c3_81 = arith.constant 3 : index
    %c0_82 = arith.constant 0 : index
    %c0_83 = arith.constant 0 : index
    %119 = vector.load %arg5[%c3_81, %c0_82, %c0_83] : memref<6x16x1xf32, #tpu.memory_space<vmem>>, vector<1x16x1xf32>
    %120 = vector.shape_cast %119 : vector<1x16x1xf32> to vector<16x1xf32>
    %121 = vector.broadcast %120 : vector<16x1xf32> to vector<16x128xf32>
    %122 = arith.addf %118, %121 : vector<16x128xf32>
    %123 = vector.extract_strided_slice %122 {offsets = [0, 0], sizes = [8, 128], strides = [1, 1]} : vector<16x128xf32> to vector<8x128xf32>
    %124 = math.tanh %123 : vector<8x128xf32>
    %125 = vector.extract_strided_slice %122 {offsets = [8, 0], sizes = [8, 128], strides = [1, 1]} : vector<16x128xf32> to vector<8x128xf32>
    %126 = arith.negf %125 : vector<8x128xf32>
    %127 = math.exp %126 : vector<8x128xf32>
    %cst_84 = arith.constant 1.000000e+00 : f32
    %128 = vector.broadcast %cst_84 : f32 to vector<8x128xf32>
    %129 = arith.addf %128, %127 : vector<8x128xf32>
    %130 = arith.divf %128, %129 : vector<8x128xf32>
    %131 = arith.mulf %124, %130 : vector<8x128xf32>
    %c3_85 = arith.constant 3 : index
    %c0_86 = arith.constant 0 : index
    %c0_87 = arith.constant 0 : index
    %132 = vector.load %arg6[%c3_85, %c0_86, %c0_87] : memref<6x20x8xf32, #tpu.memory_space<vmem>>, vector<1x20x8xf32>
    %133 = vector.shape_cast %132 : vector<1x20x8xf32> to vector<20x8xf32>
    %cst_88 = arith.constant dense<0.000000e+00> : vector<20x128xf32>
    %134 = tpu.matmul %133, %131, %cst_88 {dimension_numbers = #tpu.dot_dimension_numbers<[1], [0], [0], [1], [0, 0, 1, 1], [], []>} : vector<20x8xf32>, vector<8x128xf32>, vector<20x128xf32> -> vector<20x128xf32>
    %c3_89 = arith.constant 3 : index
    %c0_90 = arith.constant 0 : index
    %c0_91 = arith.constant 0 : index
    %135 = vector.load %arg7[%c3_89, %c0_90, %c0_91] : memref<6x20x1xf32, #tpu.memory_space<vmem>>, vector<1x20x1xf32>
    %136 = vector.shape_cast %135 : vector<1x20x1xf32> to vector<20x1xf32>
    %137 = vector.broadcast %136 : vector<20x1xf32> to vector<20x128xf32>
    %138 = arith.addf %134, %137 : vector<20x128xf32>
    %139 = vector.extract_strided_slice %138 {offsets = [0, 64], sizes = [16, 64], strides = [1, 1]} : vector<20x128xf32> to vector<16x64xf32>
    %140 = arith.addf %105, %139 : vector<16x64xf32>
    %141 = vector.extract_strided_slice %138 {offsets = [16, 0], sizes = [4, 128], strides = [1, 1]} : vector<20x128xf32> to vector<4x128xf32>
    %142 = arith.addf %141, %107 : vector<4x128xf32>
    %c2_i32_92 = arith.constant 2 : i32
    %143 = tpu.dynamic_rotate %142 by %c2_i32_92 dim 1 : vector<4x128xf32>, i32 -> vector<4x128xf32>
    %c4 = arith.constant 4 : index
    %c0_93 = arith.constant 0 : index
    %c0_94 = arith.constant 0 : index
    %144 = vector.load %arg2[%c4, %c0_93, %c0_94] : memref<6x4x4xf32, #tpu.memory_space<vmem>>, vector<1x4x4xf32>
    %145 = vector.shape_cast %144 : vector<1x4x4xf32> to vector<4x4xf32>
    %cst_95 = arith.constant dense<0.000000e+00> : vector<4x128xf32>
    %146 = tpu.matmul %145, %143, %cst_95 {dimension_numbers = #tpu.dot_dimension_numbers<[1], [0], [0], [1], [0, 0, 1, 1], [], []>} : vector<4x4xf32>, vector<4x128xf32>, vector<4x128xf32> -> vector<4x128xf32>
    %c4_96 = arith.constant 4 : index
    %c0_97 = arith.constant 0 : index
    %c0_98 = arith.constant 0 : index
    %147 = vector.load %arg3[%c4_96, %c0_97, %c0_98] : memref<6x4x4xf32, #tpu.memory_space<vmem>>, vector<1x4x4xf32>
    %148 = vector.shape_cast %147 : vector<1x4x4xf32> to vector<4x4xf32>
    %cst_99 = arith.constant dense<0.000000e+00> : vector<4x128xf32>
    %149 = tpu.matmul %148, %142, %cst_99 {dimension_numbers = #tpu.dot_dimension_numbers<[1], [0], [0], [1], [0, 0, 1, 1], [], []>} : vector<4x4xf32>, vector<4x128xf32>, vector<4x128xf32> -> vector<4x128xf32>
    %150 = arith.addf %146, %149 : vector<4x128xf32>
    %c4_100 = arith.constant 4 : index
    %c0_101 = arith.constant 0 : index
    %c0_102 = arith.constant 0 : index
    %151 = vector.load %arg4[%c4_100, %c0_101, %c0_102] : memref<6x16x4xf32, #tpu.memory_space<vmem>>, vector<1x16x4xf32>
    %152 = vector.shape_cast %151 : vector<1x16x4xf32> to vector<16x4xf32>
    %cst_103 = arith.constant dense<0.000000e+00> : vector<16x128xf32>
    %153 = tpu.matmul %152, %150, %cst_103 {dimension_numbers = #tpu.dot_dimension_numbers<[1], [0], [0], [1], [0, 0, 1, 1], [], []>} : vector<16x4xf32>, vector<4x128xf32>, vector<16x128xf32> -> vector<16x128xf32>
    %c4_104 = arith.constant 4 : index
    %c0_105 = arith.constant 0 : index
    %c0_106 = arith.constant 0 : index
    %154 = vector.load %arg5[%c4_104, %c0_105, %c0_106] : memref<6x16x1xf32, #tpu.memory_space<vmem>>, vector<1x16x1xf32>
    %155 = vector.shape_cast %154 : vector<1x16x1xf32> to vector<16x1xf32>
    %156 = vector.broadcast %155 : vector<16x1xf32> to vector<16x128xf32>
    %157 = arith.addf %153, %156 : vector<16x128xf32>
    %158 = vector.extract_strided_slice %157 {offsets = [0, 0], sizes = [8, 128], strides = [1, 1]} : vector<16x128xf32> to vector<8x128xf32>
    %159 = math.tanh %158 : vector<8x128xf32>
    %160 = vector.extract_strided_slice %157 {offsets = [8, 0], sizes = [8, 128], strides = [1, 1]} : vector<16x128xf32> to vector<8x128xf32>
    %161 = arith.negf %160 : vector<8x128xf32>
    %162 = math.exp %161 : vector<8x128xf32>
    %cst_107 = arith.constant 1.000000e+00 : f32
    %163 = vector.broadcast %cst_107 : f32 to vector<8x128xf32>
    %164 = arith.addf %163, %162 : vector<8x128xf32>
    %165 = arith.divf %163, %164 : vector<8x128xf32>
    %166 = arith.mulf %159, %165 : vector<8x128xf32>
    %c4_108 = arith.constant 4 : index
    %c0_109 = arith.constant 0 : index
    %c0_110 = arith.constant 0 : index
    %167 = vector.load %arg6[%c4_108, %c0_109, %c0_110] : memref<6x20x8xf32, #tpu.memory_space<vmem>>, vector<1x20x8xf32>
    %168 = vector.shape_cast %167 : vector<1x20x8xf32> to vector<20x8xf32>
    %cst_111 = arith.constant dense<0.000000e+00> : vector<20x128xf32>
    %169 = tpu.matmul %168, %166, %cst_111 {dimension_numbers = #tpu.dot_dimension_numbers<[1], [0], [0], [1], [0, 0, 1, 1], [], []>} : vector<20x8xf32>, vector<8x128xf32>, vector<20x128xf32> -> vector<20x128xf32>
    %c4_112 = arith.constant 4 : index
    %c0_113 = arith.constant 0 : index
    %c0_114 = arith.constant 0 : index
    %170 = vector.load %arg7[%c4_112, %c0_113, %c0_114] : memref<6x20x1xf32, #tpu.memory_space<vmem>>, vector<1x20x1xf32>
    %171 = vector.shape_cast %170 : vector<1x20x1xf32> to vector<20x1xf32>
    %172 = vector.broadcast %171 : vector<20x1xf32> to vector<20x128xf32>
    %173 = arith.addf %169, %172 : vector<20x128xf32>
    %174 = vector.extract_strided_slice %173 {offsets = [0, 64], sizes = [16, 64], strides = [1, 1]} : vector<20x128xf32> to vector<16x64xf32>
    %175 = arith.addf %140, %174 : vector<16x64xf32>
    %176 = vector.extract_strided_slice %173 {offsets = [16, 0], sizes = [4, 128], strides = [1, 1]} : vector<20x128xf32> to vector<4x128xf32>
    %177 = arith.addf %176, %142 : vector<4x128xf32>
    %c4_i32_115 = arith.constant 4 : i32
    %178 = tpu.dynamic_rotate %177 by %c4_i32_115 dim 1 : vector<4x128xf32>, i32 -> vector<4x128xf32>
    %c5 = arith.constant 5 : index
    %c0_116 = arith.constant 0 : index
    %c0_117 = arith.constant 0 : index
    %179 = vector.load %arg2[%c5, %c0_116, %c0_117] : memref<6x4x4xf32, #tpu.memory_space<vmem>>, vector<1x4x4xf32>
    %180 = vector.shape_cast %179 : vector<1x4x4xf32> to vector<4x4xf32>
    %cst_118 = arith.constant dense<0.000000e+00> : vector<4x128xf32>
    %181 = tpu.matmul %180, %178, %cst_118 {dimension_numbers = #tpu.dot_dimension_numbers<[1], [0], [0], [1], [0, 0, 1, 1], [], []>} : vector<4x4xf32>, vector<4x128xf32>, vector<4x128xf32> -> vector<4x128xf32>
    %c5_119 = arith.constant 5 : index
    %c0_120 = arith.constant 0 : index
    %c0_121 = arith.constant 0 : index
    %182 = vector.load %arg3[%c5_119, %c0_120, %c0_121] : memref<6x4x4xf32, #tpu.memory_space<vmem>>, vector<1x4x4xf32>
    %183 = vector.shape_cast %182 : vector<1x4x4xf32> to vector<4x4xf32>
    %cst_122 = arith.constant dense<0.000000e+00> : vector<4x128xf32>
    %184 = tpu.matmul %183, %177, %cst_122 {dimension_numbers = #tpu.dot_dimension_numbers<[1], [0], [0], [1], [0, 0, 1, 1], [], []>} : vector<4x4xf32>, vector<4x128xf32>, vector<4x128xf32> -> vector<4x128xf32>
    %185 = arith.addf %181, %184 : vector<4x128xf32>
    %c5_123 = arith.constant 5 : index
    %c0_124 = arith.constant 0 : index
    %c0_125 = arith.constant 0 : index
    %186 = vector.load %arg4[%c5_123, %c0_124, %c0_125] : memref<6x16x4xf32, #tpu.memory_space<vmem>>, vector<1x16x4xf32>
    %187 = vector.shape_cast %186 : vector<1x16x4xf32> to vector<16x4xf32>
    %cst_126 = arith.constant dense<0.000000e+00> : vector<16x128xf32>
    %188 = tpu.matmul %187, %185, %cst_126 {dimension_numbers = #tpu.dot_dimension_numbers<[1], [0], [0], [1], [0, 0, 1, 1], [], []>} : vector<16x4xf32>, vector<4x128xf32>, vector<16x128xf32> -> vector<16x128xf32>
    %c5_127 = arith.constant 5 : index
    %c0_128 = arith.constant 0 : index
    %c0_129 = arith.constant 0 : index
    %189 = vector.load %arg5[%c5_127, %c0_128, %c0_129] : memref<6x16x1xf32, #tpu.memory_space<vmem>>, vector<1x16x1xf32>
    %190 = vector.shape_cast %189 : vector<1x16x1xf32> to vector<16x1xf32>
    %191 = vector.broadcast %190 : vector<16x1xf32> to vector<16x128xf32>
    %192 = arith.addf %188, %191 : vector<16x128xf32>
    %193 = vector.extract_strided_slice %192 {offsets = [0, 0], sizes = [8, 128], strides = [1, 1]} : vector<16x128xf32> to vector<8x128xf32>
    %194 = math.tanh %193 : vector<8x128xf32>
    %195 = vector.extract_strided_slice %192 {offsets = [8, 0], sizes = [8, 128], strides = [1, 1]} : vector<16x128xf32> to vector<8x128xf32>
    %196 = arith.negf %195 : vector<8x128xf32>
    %197 = math.exp %196 : vector<8x128xf32>
    %cst_130 = arith.constant 1.000000e+00 : f32
    %198 = vector.broadcast %cst_130 : f32 to vector<8x128xf32>
    %199 = arith.addf %198, %197 : vector<8x128xf32>
    %200 = arith.divf %198, %199 : vector<8x128xf32>
    %201 = arith.mulf %194, %200 : vector<8x128xf32>
    %c5_131 = arith.constant 5 : index
    %c0_132 = arith.constant 0 : index
    %c0_133 = arith.constant 0 : index
    %202 = vector.load %arg6[%c5_131, %c0_132, %c0_133] : memref<6x20x8xf32, #tpu.memory_space<vmem>>, vector<1x20x8xf32>
    %203 = vector.shape_cast %202 : vector<1x20x8xf32> to vector<20x8xf32>
    %cst_134 = arith.constant dense<0.000000e+00> : vector<20x128xf32>
    %204 = tpu.matmul %203, %201, %cst_134 {dimension_numbers = #tpu.dot_dimension_numbers<[1], [0], [0], [1], [0, 0, 1, 1], [], []>} : vector<20x8xf32>, vector<8x128xf32>, vector<20x128xf32> -> vector<20x128xf32>
    %c5_135 = arith.constant 5 : index
    %c0_136 = arith.constant 0 : index
    %c0_137 = arith.constant 0 : index
    %205 = vector.load %arg7[%c5_135, %c0_136, %c0_137] : memref<6x20x1xf32, #tpu.memory_space<vmem>>, vector<1x20x1xf32>
    %206 = vector.shape_cast %205 : vector<1x20x1xf32> to vector<20x1xf32>
    %207 = vector.broadcast %206 : vector<20x1xf32> to vector<20x128xf32>
    %208 = arith.addf %204, %207 : vector<20x128xf32>
    %209 = vector.extract_strided_slice %208 {offsets = [0, 64], sizes = [16, 64], strides = [1, 1]} : vector<20x128xf32> to vector<16x64xf32>
    %210 = arith.addf %175, %209 : vector<16x64xf32>
    %c0_138 = arith.constant 0 : index
    %c0_139 = arith.constant 0 : index
    %c0_140 = arith.constant 0 : index
    %211 = vector.load %arg8[%c0_138, %c0_139, %c0_140] : memref<1x16x64xf32, #tpu.memory_space<vmem>>, vector<1x16x64xf32>
    %212 = vector.shape_cast %211 : vector<1x16x64xf32> to vector<16x64xf32>
    %213 = vector.shape_cast %210 : vector<16x64xf32> to vector<1x16x64xf32>
    tpu.vector_store %arg8[%c0_138, %c0_139, %c0_140], %213 {strides = array<i32>} : memref<1x16x64xf32, #tpu.memory_space<vmem>>, vector<1x16x64xf32>,
    return
  }
  func.func @transform_0(%arg0: i32) -> (i32, i32, i32) {
    %c0_i32 = arith.constant 0 : i32
    %c0_i32_0 = arith.constant 0 : i32
    %c0_i32_1 = arith.constant 0 : i32
    return %arg0, %c0_i32, %c0_i32_0 : i32, i32, i32
  }
  func.func @transform_1(%arg0: i32) -> (i32, i32, i32) {
    %c0_i32 = arith.constant 0 : i32
    %c0_i32_0 = arith.constant 0 : i32
    %c0_i32_1 = arith.constant 0 : i32
    %c0_i32_2 = arith.constant 0 : i32
    return %c0_i32, %c0_i32_0, %c0_i32_1 : i32, i32, i32
  }
  func.func @transform_2(%arg0: i32) -> (i32, i32, i32) {
    %c0_i32 = arith.constant 0 : i32
    %c0_i32_0 = arith.constant 0 : i32
    %c0_i32_1 = arith.constant 0 : i32
    %c0_i32_2 = arith.constant 0 : i32
    return %c0_i32, %c0_i32_0, %c0_i32_1 : i32, i32, i32
  }
  func.func @transform_3(%arg0: i32) -> (i32, i32, i32) {
    %c0_i32 = arith.constant 0 : i32
    %c0_i32_0 = arith.constant 0 : i32
    %c0_i32_1 = arith.constant 0 : i32
    %c0_i32_2 = arith.constant 0 : i32
    return %c0_i32, %c0_i32_0, %c0_i32_1 : i32, i32, i32
  }
  func.func @transform_4(%arg0: i32) -> (i32, i32, i32) {
    %c0_i32 = arith.constant 0 : i32
    %c0_i32_0 = arith.constant 0 : i32
    %c0_i32_1 = arith.constant 0 : i32
    %c0_i32_2 = arith.constant 0 : i32
    return %c0_i32, %c0_i32_0, %c0_i32_1 : i32, i32, i32
  }
  func.func @transform_5(%arg0: i32) -> (i32, i32, i32) {
    %c0_i32 = arith.constant 0 : i32
    %c0_i32_0 = arith.constant 0 : i32
    %c0_i32_1 = arith.constant 0 : i32
    %c0_i32_2 = arith.constant 0 : i32
    return %c0_i32, %c0_i32_0, %c0_i32_1 : i32, i32, i32
  }
  func.func @transform_6(%arg0: i32) -> (i32, i32, i32) {
    %c0_i32 = arith.constant 0 : i32
    %c0_i32_0 = arith.constant 0 : i32
    %c0_i32_1 = arith.constant 0 : i32
    %c0_i32_2 = arith.constant 0 : i32
    return %c0_i32, %c0_i32_0, %c0_i32_1 : i32, i32, i32
  }
  func.func @transform_7(%arg0: i32) -> (i32, i32, i32) {
    %c0_i32 = arith.constant 0 : i32
    %c0_i32_0 = arith.constant 0 : i32
    %c0_i32_1 = arith.constant 0 : i32
    return %arg0, %c0_i32, %c0_i32_0 : i32, i32, i32
  }
}

</mosaic_0001>

<bundles_post_ra>
// kernel: residual_stack_forward.1
= control target key start
LH: loop header
LB: loop body
LE: loop exit
PB: predicated region body
PF: predicated region fallthrough
CT: control target
= control target key end

     0   :  { %12 = vsyncpa [#allocation3], 0  ;;  %s3717_s0 = inlined_call_operand.vmem [shape: f32[2,4,128], index: 0, kind: input, shape index: {}]   ;;  %s3718_s1 = inlined_call_operand.vmem [shape: f32[6,4,4], index: 1, kind: input, shape index: {}]   ;;  %s3719_s2 = inlined_call_operand.vmem [shape: f32[6,4,4], index: 2, kind: input, shape index: {}]   ;;  %s3720_s3 = inlined_call_operand.vmem [shape: f32[6,16,4], index: 3, kind: input, shape index: {}]   ;;  %s3721_s4 = inlined_call_operand.vmem [shape: f32[6,16,1], index: 4, kind: input, shape index: {}]   ;;  %s3722_s5 = inlined_call_operand.vmem [shape: f32[6,20,8], index: 5, kind: input, shape index: {}]   ;;  %s3723_s6 = inlined_call_operand.vmem [shape: f32[6,20,1], index: 6, kind: input, shape index: {}]   ;;  %s3724_s7 = inlined_call_operand.hbm [shape: f32[2,16,64], index: 7, kind: output, shape index: {}]  }
   0x1   :  { %14 = vsyncpa [#allocation3 + $0x1], 0  ;;  %s3246_s24 = smov 0   ;;  %s3248_s25 = smov 0  }
   0x2   :  { %s3250_s26 = smov 0   ;;  %s3252_s27 = smov 0  }
   0x3 LB: > { %s3267_s28 = sadd.s32 4294967295, %s3194_s27   ;;  %s2642_s29 = sadd.s32 4294967294, %s3194_s27   ;;  %s3194_s27 = sphi %s3252_s27, %s3730_s27   ;;  %s3190_s26 = sphi %s3250_s26, %s3729_s26   ;;  %s3186_s25 = sphi %s3248_s25, %s3728_s25   ;;  %s3182_s24 = sphi %s3246_s24, %s3727_s24  }
   0x4   : > { %s3271_s30 = sadd.s32 1, %s3194_s27   ;;  %s179_s8 = sadd.s32 1, %s3190_s26 }
   0x5   : > { %s176_s9 = ssub.s32 %s3194_s27, %s3271_s30  ;;  %p189_p0 = scmp.ne.s32.totalorder %s3190_s26, %s3186_s25 }
   0x6   : > { %p177_p1 = scmp.eq.s32.totalorder %s176_s9, 0  ;;  %p190_p2 = scmp.eq.s32.totalorder %s3267_s28, 1 }
   0x7   : > { %p195_p3 = scmp.ne.s32.totalorder %s3186_s25, %s3182_s24  ;;  %p196_p4 = scmp.eq.s32.totalorder %s2642_s29, 1 }
   0x8   : > { %s3282_s10 = scalar_select %p177_p1, %s3190_s26, %s179_s8  }
   0x9   : > { %p3284_p5 = por %p190_p2, %p189_p0  ;;  %p3288_p6 = por %p196_p4, %p195_p3 }
   0xa   : > { %p2645_p7 = scmp.ge.s32.totalorder %s3194_s27, 1  ;;  %p239_p8 = scmp.lt.s32.totalorder %s3194_s27, 3 }
   0xc   : > { %p240_p9 = pnand %p2645_p7, %p239_p8 }
   0xd   : > { %p270_p10 = scmp.lt.s32.totalorder (!%p240_p9), %s3267_s28, 1  ;;  %v3196_v0 = vmov (!%p240_p9), 0.0   ;;  %vm3197_vm0 = vmmov (!%p240_p9), 0   ;;  %vm283_vm1 = vcmask (!%p240_p9), 1043456   ;;  %v278_v1 = vld [vmem:[%s3719_s2] sm:$0xf] (!%p240_p9) }
   0xe   : > { %243 = sbr.rel (%p240_p9) target bundleno = 4932 (0x1344), region = 48  ;;  %2846 = vmatprep.subr.mxu0 (!%p240_p9), %v3196_v0  ;;  %2848 = vmatprep.mubr.msk.f32.mxu0 (!%p240_p9), %vm3197_vm0, %v3196_v0  ;;  %vm279_vm2 = vcmask (!%p240_p9), 31744   ;;  %s3198_s20 = smov (!%p240_p9), 1   ;;  %v277_v3 = vld [vmem:[%s3718_s1] sm:$0xf] (!%p240_p9)  ;;  %v436_v6 = vld [vmem:[%s3721_s4 + $0x8] sm:$0xff] (!%p240_p9) }
   0xf   : > { %2861 = vmatprep.subr.mxu1 (!%p240_p9), %v3196_v0  ;;  %2863 = vmatprep.mubr.msk.f32.mxu1 (!%p240_p9), %vm3197_vm0, %v3196_v0  ;;  %v433_v5 = vld [vmem:[%s3720_s3] sm:$0xff] (!%p240_p9)  ;;  %v3199_v7 = vmov (!%p240_p9), 0   ;;  %v2668_v8 = vld [vmem:[%s3721_s4 + $0x18] sm:$0xff] (!%p240_p9)  ;;  %v2678_v10 = vld [vmem:[%s3723_s6 + $0x28] sm:$0xf] (!%p240_p9)  ;;  %vm560_vm3 = vcmask (!%p240_p9), 64512  }
  0x10   : > { %3094 = vset.pattern.permute.xlu0 (!%p240_p9), %v3199_v7  ;;  %3095 = vset.pattern.permute.xlu1 (!%p240_p9), %v3199_v7  ;;  %v435_v9 = vld [vmem:[%s3721_s4] sm:$0xff] (!%p240_p9)  ;;  %v544_v11 = vld [vmem:[%s3723_s6 + $0x10] sm:$0xf] (!%p240_p9)  ;;  %v2691_v12 = vld [vmem:[%s3721_s4 + $0x28] sm:$0xff] (!%p240_p9)  ;;  %s3200_s18 = smov (!%p240_p9), 2   ;;  %s3201_s29 = smov (!%p240_p9), 4  }
  0x11   : > { %439 = vperm.xlu1 (!%p240_p9), %3095, %v435_v9   ;;  %v2701_v13 = vld [vmem:[%s3723_s6 + $0x40] sm:$0xf] (!%p240_p9)  ;;  %v2714_v14 = vld [vmem:[%s3721_s4 + $0x38] sm:$0xff] (!%p240_p9)  ;;  %v2737_v16 = vld [vmem:[%s3721_s4 + $0x48] sm:$0xff] (!%p240_p9)  ;;  %s3202_s22 = smov (!%p240_p9), 64   ;;  %s267_s23 = sand.u32 (!%p240_p9), 1, %s3186_s25  }
  0x12   : > { %v2724_v15 = vld [vmem:[%s3723_s6 + $0x58] sm:$0xf] (!%p240_p9)  ;;  %v2747_v17 = vld [vmem:[%s3723_s6 + $0x70] sm:$0xf] (!%p240_p9)  ;;  %v542_v19 = vld [vmem:[%s3723_s6] sm:$0xff] (!%p240_p9)  ;;  %s2646_s8 = sshll.u32 (!%p240_p9), %s267_s23, 4 }
  0x13   : > { %v2760_v18 = vld [vmem:[%s3721_s4 + $0x58] sm:$0xff] (!%p240_p9)  ;;  %v2699_v21 = vld [vmem:[%s3723_s6 + $0x30] sm:$0xff] (!%p240_p9)  ;;  %v2722_v22 = vld [vmem:[%s3723_s6 + $0x48] sm:$0xff] (!%p240_p9)  ;;  %vm2563_vm4 = vcmask (!%p240_p9), 523264   ;;  %s3676_s16 = scalar_lea.sflag (!%p240_p9), [#allocation3], %s267_s23 }
  0x14   : > { %v2676_v20 = vld [vmem:[%s3723_s6 + $0x18] sm:$0xff] (!%p240_p9)  ;;  %v2745_v23 = vld [vmem:[%s3723_s6 + $0x60] sm:$0xff] (!%p240_p9)  ;;  %v434_v26 = vld [vmem:[%s3720_s3 + $0x8] sm:$0xff] (!%p240_p9) }
  0x15   : > { %s271_s13 = scalar_select %p270_p10, %s3267_s28, 1  ;;  %557 = vperm.xlu1 %3095, %v544_v11   ;;  %v2768_v24 = vld [vmem:[%s3723_s6 + $0x78] sm:$0xff]  ;;  %v539_v40 = vld [vmem:[%s3722_s5] sm:$0xff]  ;;  %v540_v41 = vld [vmem:[%s3722_s5 + $0x8] sm:$0xff] }
  0x16   : > { %v541_v42 = vld [vmem:[%s3722_s5 + $0x10] sm:$0xf]  ;;  %v2660_v48 = vld [vmem:[%s3719_s2 + $0x4] sm:$0xf]  ;;  %v2666_v54 = vld [vmem:[%s3720_s3 + $0x18] sm:$0xff] }
  0x17   : > { %s2647_s14 = sshll.u32 %s271_s13, 2  ;;  %v2667_v49 = vld [vmem:[%s3721_s4 + $0x10] sm:$0xff]  ;;  %v2659_v50 = vld [vmem:[%s3718_s1 + $0x4] sm:$0xf]  ;;  %v2675_v7 = vld [vmem:[%s3722_s5 + $0x28] sm:$0xf] }
  0x18   : > { %s273_s17 = scalar_lea.vmem %s3717_s0, %s2647_s14  ;;  %v2665_v52 = vld [vmem:[%s3720_s3 + $0x10] sm:$0xff]  ;;  %s2779_s13 = sshll.u32 %s3267_s28, 8 }
  0x19   : > { %v3308_v2 = vld [vmem:[%s273_s17] sm:$0xf]  ;;  %s3674_s15 = scalar_lea.hbm %s3724_s7, %s2779_s13  ;;  %s3203_s28 = smov [#allocation2]  }
  0x1a   : > { %275 = vrot.lane.b32.xlu0 %v3308_v2, %s3198_s20  ;;  %2847 = vmatpush3.msk.msra.mxu0 %vm283_vm1, %v3308_v2  ;;  %s3136_s19 = sshll.u32 %s3203_s28, 4  ;;  %s3137_s19 = int_to_ptr.vmem [resolvable:$false] %s3136_s19 }
  0x1b   : > { %2849 = vmatmul.mubr.msk.f32.vlgmr.msra.gmra.mrb[0].mxu0 %vm279_vm2, %v278_v1  ;;  %2851 = vmatprep.subr.mxu0 %v3196_v0  ;;  %s3138_s21 = scalar_lea.vmem %s3137_s19, 512 }
  0x1c   : > { %2853 = vmatprep.mubr.msk.f32.mxu0 %vm3197_vm0, %v3196_v0 }
  0x1e   : > { %444 = vperm.xlu0 %3094, %v436_v6   ;;  %v2674_v6 = vld [vmem:[%s3722_s5 + $0x20] sm:$0xff] }
  0x22   : > { %824 = vperm.xlu0 %3094, %v2668_v8  }
  0x26   : > { %939 = vperm.xlu0 %3094, %v2678_v10  }
  0x2a   : > { %1205 = vperm.xlu0 %3094, %v2691_v12  }
  0x2e   : > { %1320 = vperm.xlu0 %3094, %v2701_v13   ;;  %v2683_v13 = vld [vmem:[%s3719_s2 + $0x8] sm:$0xf] }
  0x32   : > { %1586 = vperm.xlu0 %3094, %v2714_v14   ;;  %v2690_v14 = vld [vmem:[%s3721_s4 + $0x20] sm:$0xff] }
  0x36   : > { %1701 = vperm.xlu0 %3094, %v2724_v15   ;;  %v2682_v15 = vld [vmem:[%s3718_s1 + $0x8] sm:$0xf] }
  0x3a   : > { %1967 = vperm.xlu0 %3094, %v2737_v16  }
  0x3e   : > { %2082 = vperm.xlu0 %3094, %v2747_v17   ;;  %v2688_v17 = vld [vmem:[%s3720_s3 + $0x20] sm:$0xff] }
  0x42   : > { %2348 = vperm.xlu0 %3094, %v2760_v18  }
  0x46   : > { %547 = vperm.xlu0 %3094, %v542_v19   ;;  %v2689_v19 = vld [vmem:[%s3720_s3 + $0x28] sm:$0xff] }
  0x4a   : > { %929 = vperm.xlu0 %3094, %v2676_v20  }
  0x4e   : > { %1310 = vperm.xlu0 %3094, %v2699_v21  }
  0x52   : > { %1691 = vperm.xlu0 %3094, %v2722_v22  }
  0x56   : > { %2072 = vperm.xlu0 %3094, %v2745_v23  }
  0x5a   : > { %2453 = vperm.xlu0 %3094, %v2768_v24  }
  0x8c   : > { %v276_v4 = vpop.permute.xlu0 %275 }
  0x8d   : > { %2852 = vmatpush3.msk.msra.mxu0 %vm283_vm1, %v276_v4 }
  0x8e   : > { %2854 = vmatmul.mubr.msk.f32.vlgmr.msra.gmra.mrb[0].mxu0 %vm279_vm2, %v277_v3 }
  0x8f   : > { %2858 = vmatprep.mubr.msk.f32.mxu0 %vm279_vm2, %v433_v5  ;;  %v2673_v5 = vld [vmem:[%s3722_s5 + $0x18] sm:$0xff] }
  0x90   : > { %v440_v33 = vpop.permute.xlu1 %439 }
  0x94   : > { %v558_v43 = vpop.permute.xlu1 %557 }
  0x9d   : > { %v445_v28 = vpop.permute.xlu0 %444 }
  0xa1   : > { %v825_v56 = vpop.permute.xlu0 %824 }
  0xa5   : > { %v940_v8 = vpop.permute.xlu0 %939 }
  0xa9   : > { %v1206_v21 = vpop.permute.xlu0 %1205 }
 0x161   : > { %v429_v25 = vpop.f32.mrb[0].mxu0 }
 0x162   : > { %v2855_v27 = vpop.f32.mrb[1].mxu0  ;;  %2856 = vmatprep.subr.msk.mxu0 %vm283_vm1, %v429_v25 }
 0x163   : > { %2857 = vmatpush3.msk.msra.mxu0 %vm283_vm1, %v429_v25 }
 0x164   : > { %2859 = vmatmul.mubr.msk.f32.vlgmr.msra.gmra.mrb[2].mxu0 %vm279_vm2, %v434_v26  ;;  %2872 = vmatprep.subr.mxu0 %v3196_v0 }
 0x165   : > { %2874 = vmatprep.mubr.msk.f32.mxu0 %vm3197_vm0, %v3196_v0 }
 0x237   : > { %v2860_v29 = vpop.f32.mrb[2].mxu0 }
 0x238   : > { %v528_v30 = vadd.f32 %v2860_v29, %v445_v28  ;;  %v522_v31 = vpop.f32.mrb[3].mxu0 }
 0x239   : > { %v523_v34 = vadd.f32 %v522_v31, %v440_v33  ;;  %v2696_v33 = vld [vmem:[%s3722_s5 + $0x30] sm:$0xff] }
 0x23a   : > { %v2655_v32 = vmul.f32 -1.442695, %v528_v30 }
 0x23c   : > { %3096 = vpow2.f32 %v2655_v32 }
 0x23d   : > { %3098 = vtanh.f32 %v523_v34  ;;  %v2697_v34 = vld [vmem:[%s3722_s5 + $0x38] sm:$0xff] }
 0x246   : > { %v3097_v35 = vpop.eup %3096 }
 0x247   : > { %v535_v36 = vadd.f32 1.0, %v3097_v35  ;;  %v3099_v37 = vpop.eup %3098  ;;  %v2698_v35 = vld [vmem:[%s3722_s5 + $0x40] sm:$0xf] }
 0x249   : > { %3100 = vrcp.f32 %v535_v36  ;;  %v1321_v36 = vpop.permute.xlu0 %1320 }
 0x253   : > { %v3101_v38 = vpop.eup %3100 }
 0x254   : > { %v538_v39 = vmul.f32 %v3101_v38, %v3099_v37 }
 0x256   : > { %2862 = vmatpush3.msra.mxu1 %v538_v39 }
 0x257   : > { %2864 = vmatmul.mubr.msk.f32.vlgmr.msra.gmra.mrb[0].mxu1 %vm560_vm3, %v539_v40  ;;  %2887 = vmatprep.subr.mxu1 %v3196_v0 }
 0x258   : > { %2866 = vmatprep.mubr.msk.f32.mxu1 %vm3197_vm0, %v3196_v0 }
 0x25b   : > { %2867 = vmatmul.mubr.msk.f32.gmra.mrb[2].mxu1 %vm560_vm3, %v540_v41  ;;  %v2706_v41 = vld [vmem:[%s3719_s2 + $0xc] sm:$0xf] }
 0x25c   : > { %2869 = vmatprep.mubr.msk.f32.mxu1 %vm3197_vm0, %v3196_v0 }
 0x25f   : > { %2870 = vmatmul.mubr.msk.f32.gmra.mrb[4].mxu1 %vm560_vm3, %v541_v42  ;;  %v2713_v42 = vld [vmem:[%s3721_s4 + $0x30] sm:$0xff] }
 0x260   : > { %2889 = vmatprep.mubr.msk.f32.mxu1 %vm3197_vm0, %v3196_v0 }
 0x332   : > { %v646_v44 = vpop.f32.mrb[4].mxu1 }
 0x333   : > { %v647_v45 = vadd.f32 %v646_v44, %v558_v43  ;;  %v2871_v46 = vpop.f32.mrb[5].mxu1  ;;  %v2705_v43 = vld [vmem:[%s3718_s1 + $0xc] sm:$0xf] }
 0x335   : > { %v652_v47 = vadd.f32 %v647_v45, %v3308_v2  ;;  %v2711_v45 = vld [vmem:[%s3720_s3 + $0x30] sm:$0xff] }
 0x337   : > { %653 = vrot.lane.b32.xlu1 %v652_v47, %s3200_s18  ;;  %2873 = vmatpush3.msk.msra.mxu0 %vm283_vm1, %v652_v47 }
 0x338   : > { %2875 = vmatmul.mubr.msk.f32.vlgmr.msra.gmra.mrb[4].mxu0 %vm279_vm2, %v2660_v48  ;;  %2877 = vmatprep.subr.mxu0 %v3196_v0 }
 0x339   : > { %2879 = vmatprep.mubr.msk.f32.mxu0 %vm3197_vm0, %v3196_v0 }
 0x33b   : > { %819 = vperm.xlu1 %3095, %v2667_v49   ;;  %v1587_v49 = vpop.permute.xlu0 %1586 }
 0x3a9   : > { %v654_v51 = vpop.permute.xlu1 %653 }
 0x3aa   : > { %2878 = vmatpush3.msk.msra.mxu0 %vm283_vm1, %v654_v51 }
 0x3ab   : > { %2880 = vmatmul.mubr.msk.f32.vlgmr.msra.gmra.mrb[4].mxu0 %vm279_vm2, %v2659_v50 }
 0x3ac   : > { %2884 = vmatprep.mubr.msk.f32.mxu0 %vm279_vm2, %v2665_v52 }
 0x3ba   : > { %v820_v61 = vpop.permute.xlu1 %819 }
 0x47e   : > { %v807_v53 = vpop.f32.mrb[4].mxu0 }
 0x47f   : > { %v2881_v55 = vpop.f32.mrb[5].mxu0  ;;  %2882 = vmatprep.subr.msk.mxu0 %vm283_vm1, %v807_v53 }
 0x480   : > { %2883 = vmatpush3.msk.msra.mxu0 %vm283_vm1, %v807_v53 }
 0x481   : > { %2885 = vmatmul.mubr.msk.f32.vlgmr.msra.gmra.mrb[6].mxu0 %vm279_vm2, %v2666_v54  ;;  %2898 = vmatprep.subr.mxu0 %v3196_v0 }
 0x482   : > { %2900 = vmatprep.mubr.msk.f32.mxu0 %vm3197_vm0, %v3196_v0 }
 0x554   : > { %v2886_v57 = vpop.f32.mrb[6].mxu0 }
 0x555   : > { %v908_v58 = vadd.f32 %v2886_v57, %v825_v56  ;;  %v902_v59 = vpop.f32.mrb[7].mxu0 }
 0x556   : > { %v903_v62 = vadd.f32 %v902_v59, %v820_v61  ;;  %v2719_v61 = vld [vmem:[%s3722_s5 + $0x48] sm:$0xff] }
 0x557   : > { %v2672_v60 = vmul.f32 -1.442695, %v908_v58 }
 0x559   : > { %3102 = vpow2.f32 %v2672_v60 }
 0x55a   : > { %3104 = vtanh.f32 %v903_v62  ;;  %v2720_v62 = vld [vmem:[%s3722_s5 + $0x50] sm:$0xff] }
 0x563   : > { %v3103_v63 = vpop.eup %3102 }
 0x564   : > { %v915_v1 = vadd.f32 1.0, %v3103_v63  ;;  %v3105_v2 = vpop.eup %3104  ;;  %v2721_v63 = vld [vmem:[%s3722_s5 + $0x58] sm:$0xf] }
 0x566   : > { %3106 = vrcp.f32 %v915_v1  ;;  %v1702_v1 = vpop.permute.xlu0 %1701 }
 0x570   : > { %v3107_v3 = vpop.eup %3106 }
 0x571   : > { %v918_v4 = vmul.f32 %v3107_v3, %v3105_v2 }
 0x573   : > { %2888 = vmatpush3.msra.mxu1 %v918_v4 }
 0x574   : > { %2890 = vmatmul.mubr.msk.f32.vlgmr.msra.gmra.mrb[0].mxu1 %vm560_vm3, %v2673_v5  ;;  %2913 = vmatprep.subr.mxu1 %v3196_v0 }
 0x575   : > { %2892 = vmatprep.mubr.msk.f32.mxu1 %vm3197_vm0, %v3196_v0 }
 0x578   : > { %2893 = vmatmul.mubr.msk.f32.gmra.mrb[2].mxu1 %vm560_vm3, %v2674_v6  ;;  %v2729_v6 = vld [vmem:[%s3719_s2 + $0x10] sm:$0xf] }
 0x579   : > { %2895 = vmatprep.mubr.msk.f32.mxu1 %vm3197_vm0, %v3196_v0 }
 0x57c   : > { %2896 = vmatmul.mubr.msk.f32.gmra.mrb[6].mxu1 %vm560_vm3, %v2675_v7  ;;  %v2736_v7 = vld [vmem:[%s3721_s4 + $0x40] sm:$0xff] }
 0x57d   : > { %2915 = vmatprep.mubr.msk.f32.mxu1 %vm3197_vm0, %v3196_v0 }
 0x64f   : > { %v1027_v9 = vpop.f32.mrb[6].mxu1 }
 0x650   : > { %v1028_v10 = vadd.f32 %v1027_v9, %v940_v8  ;;  %v2897_v11 = vpop.f32.mrb[7].mxu1  ;;  %v2728_v8 = vld [vmem:[%s3718_s1 + $0x10] sm:$0xf] }
 0x652   : > { %v1033_v12 = vadd.f32 %v1028_v10, %v652_v47  ;;  %v2712_v47 = vld [vmem:[%s3720_s3 + $0x38] sm:$0xff]  ;;  %v2734_v10 = vld [vmem:[%s3720_s3 + $0x40] sm:$0xff] }
 0x654   : > { %1034 = vrot.lane.b32.xlu1 %v1033_v12, %s3201_s29  ;;  %2899 = vmatpush3.msk.msra.mxu0 %vm283_vm1, %v1033_v12 }
 0x655   : > { %2901 = vmatmul.mubr.msk.f32.vlgmr.msra.gmra.mrb[8].mxu0 %vm279_vm2, %v2683_v13  ;;  %2903 = vmatprep.subr.mxu0 %v3196_v0 }
 0x656   : > { %2905 = vmatprep.mubr.msk.f32.mxu0 %vm3197_vm0, %v3196_v0 }
 0x658   : > { %1200 = vperm.xlu1 %3095, %v2690_v14   ;;  %v1968_v14 = vpop.permute.xlu0 %1967 }
 0x6c6   : > { %v1035_v16 = vpop.permute.xlu1 %1034 }
 0x6c7   : > { %2904 = vmatpush3.msk.msra.mxu0 %vm283_vm1, %v1035_v16 }
 0x6c8   : > { %2906 = vmatmul.mubr.msk.f32.vlgmr.msra.gmra.mrb[8].mxu0 %vm279_vm2, %v2682_v15 }
 0x6c9   : > { %2910 = vmatprep.mubr.msk.f32.mxu0 %vm279_vm2, %v2688_v17 }
 0x6d7   : > { %v1201_v26 = vpop.permute.xlu1 %1200 }
 0x79b   : > { %v1188_v18 = vpop.f32.mrb[8].mxu0 }
 0x79c   : > { %v2907_v20 = vpop.f32.mrb[9].mxu0  ;;  %2908 = vmatprep.subr.msk.mxu0 %vm283_vm1, %v1188_v18 }
 0x79d   : > { %2909 = vmatpush3.msk.msra.mxu0 %vm283_vm1, %v1188_v18 }
 0x79e   : > { %2911 = vmatmul.mubr.msk.f32.vlgmr.msra.gmra.mrb[10].mxu0 %vm279_vm2, %v2689_v19  ;;  %2924 = vmatprep.subr.mxu0 %v3196_v0 }
 0x79f   : > { %2926 = vmatprep.mubr.msk.f32.mxu0 %vm3197_vm0, %v3196_v0 }
 0x871   : > { %v2912_v22 = vpop.f32.mrb[10].mxu0 }
 0x872   : > { %v1289_v23 = vadd.f32 %v2912_v22, %v1206_v21  ;;  %v1283_v24 = vpop.f32.mrb[11].mxu0 }
 0x873   : > { %v1284_v27 = vadd.f32 %v1283_v24, %v1201_v26  ;;  %v2742_v26 = vld [vmem:[%s3722_s5 + $0x60] sm:$0xff] }
 0x874   : > { %v2695_v25 = vmul.f32 -1.442695, %v1289_v23 }
 0x876   : > { %3108 = vpow2.f32 %v2695_v25 }
 0x877   : > { %3110 = vtanh.f32 %v1284_v27  ;;  %v2743_v27 = vld [vmem:[%s3722_s5 + $0x68] sm:$0xff] }
 0x880   : > { %v3109_v28 = vpop.eup %3108 }
 0x881   : > { %v1296_v29 = vadd.f32 1.0, %v3109_v28  ;;  %v3111_v30 = vpop.eup %3110  ;;  %v2744_v28 = vld [vmem:[%s3722_s5 + $0x70] sm:$0xf] }
 0x883   : > { %3112 = vrcp.f32 %v1296_v29  ;;  %v2083_v29 = vpop.permute.xlu0 %2082 }
 0x88d   : > { %v3113_v31 = vpop.eup %3112 }
 0x88e   : > { %v1299_v32 = vmul.f32 %v3113_v31, %v3111_v30 }
 0x890   : > { %2914 = vmatpush3.msra.mxu1 %v1299_v32 }
 0x891   : > { %2916 = vmatmul.mubr.msk.f32.vlgmr.msra.gmra.mrb[0].mxu1 %vm560_vm3, %v2696_v33  ;;  %2939 = vmatprep.subr.mxu1 %v3196_v0 }
 0x892   : > { %2918 = vmatprep.mubr.msk.f32.mxu1 %vm3197_vm0, %v3196_v0 }
 0x895   : > { %2919 = vmatmul.mubr.msk.f32.gmra.mrb[2].mxu1 %vm560_vm3, %v2697_v34  ;;  %v2752_v34 = vld [vmem:[%s3719_s2 + $0x14] sm:$0xf] }
 0x896   : > { %2921 = vmatprep.mubr.msk.f32.mxu1 %vm3197_vm0, %v3196_v0 }
 0x899   : > { %2922 = vmatmul.mubr.msk.f32.gmra.mrb[8].mxu1 %vm560_vm3, %v2698_v35  ;;  %v2759_v35 = vld [vmem:[%s3721_s4 + $0x50] sm:$0xff] }
 0x89a   : > { %2941 = vmatprep.mubr.msk.f32.mxu1 %vm3197_vm0, %v3196_v0 }
 0x96c   : > { %v1408_v37 = vpop.f32.mrb[8].mxu1 }
 0x96d   : > { %v1409_v38 = vadd.f32 %v1408_v37, %v1321_v36  ;;  %v2923_v39 = vpop.f32.mrb[9].mxu1  ;;  %v543_v36 = vld [vmem:[%s3723_s6 + $0x8] sm:$0xff]  ;;  %v2677_v37 = vld [vmem:[%s3723_s6 + $0x20] sm:$0xff] }
 0x96e   : > { %v2723_v39 = vld [vmem:[%s3723_s6 + $0x50] sm:$0xff] }
 0x96f   : > { %v1414_v40 = vadd.f32 %v1409_v38, %v1033_v12  ;;  %v2735_v12 = vld [vmem:[%s3720_s3 + $0x48] sm:$0xff]  ;;  %v2700_v38 = vld [vmem:[%s3723_s6 + $0x38] sm:$0xff] }
 0x971   : > { %1415 = vrot.lane.b32.xlu1 %v1414_v40, %s3198_s20  ;;  %2925 = vmatpush3.msk.msra.mxu0 %vm283_vm1, %v1414_v40 }
 0x972   : > { %2927 = vmatmul.mubr.msk.f32.vlgmr.msra.gmra.mrb[12].mxu0 %vm279_vm2, %v2706_v41  ;;  %2929 = vmatprep.subr.mxu0 %v3196_v0  ;;  %v2769_v41 = vld [vmem:[%s3723_s6 + $0x80] sm:$0xff] }
 0x973   : > { %2931 = vmatprep.mubr.msk.f32.mxu0 %vm3197_vm0, %v3196_v0 }
 0x975   : > { %1581 = vperm.xlu1 %3095, %v2713_v42   ;;  %v2751_v42 = vld [vmem:[%s3718_s1 + $0x14] sm:$0xf] }
 0x9e3   : > { %v1416_v44 = vpop.permute.xlu1 %1415 }
 0x9e4   : > { %2930 = vmatpush3.msk.msra.mxu0 %vm283_vm1, %v1416_v44  ;;  %v2757_v44 = vld [vmem:[%s3720_s3 + $0x50] sm:$0xff] }
 0x9e5   : > { %2932 = vmatmul.mubr.msk.f32.vlgmr.msra.gmra.mrb[12].mxu0 %vm279_vm2, %v2705_v43 }
 0x9e6   : > { %2936 = vmatprep.mubr.msk.f32.mxu0 %vm279_vm2, %v2711_v45 }
 0x9f4   : > { %v1582_v54 = vpop.permute.xlu1 %1581 }
 0xab8   : > { %v1569_v46 = vpop.f32.mrb[12].mxu0 }
 0xab9   : > { %v2933_v48 = vpop.f32.mrb[13].mxu0  ;;  %2934 = vmatprep.subr.msk.mxu0 %vm283_vm1, %v1569_v46 }
 0xaba   : > { %2935 = vmatpush3.msk.msra.mxu0 %vm283_vm1, %v1569_v46  ;;  %v2758_v46 = vld [vmem:[%s3720_s3 + $0x58] sm:$0xff]  ;;  %v2349_v48 = vpop.permute.xlu0 %2348 }
 0xabb   : > { %2937 = vmatmul.mubr.msk.f32.vlgmr.msra.gmra.mrb[14].mxu0 %vm279_vm2, %v2712_v47  ;;  %2950 = vmatprep.subr.mxu0 %v3196_v0 }
 0xabc   : > { %2952 = vmatprep.mubr.msk.f32.mxu0 %vm3197_vm0, %v3196_v0 }
 0xb8e   : > { %v2938_v50 = vpop.f32.mrb[14].mxu0 }
 0xb8f   : > { %v1670_v51 = vadd.f32 %v2938_v50, %v1587_v49  ;;  %v1664_v52 = vpop.f32.mrb[15].mxu0 }
 0xb90   : > { %v1665_v55 = vadd.f32 %v1664_v52, %v1582_v54 }
 0xb91   : > { %v2718_v53 = vmul.f32 -1.442695, %v1670_v51 }
 0xb93   : > { %3114 = vpow2.f32 %v2718_v53 }
 0xb94   : > { %3116 = vtanh.f32 %v1665_v55 }
 0xb9d   : > { %v3115_v56 = vpop.eup %3114 }
 0xb9e   : > { %v1677_v57 = vadd.f32 1.0, %v3115_v56  ;;  %v3117_v58 = vpop.eup %3116 }
 0xba0   : > { %3118 = vrcp.f32 %v1677_v57 }
 0xbaa   : > { %v3119_v59 = vpop.eup %3118 }
 0xbab   : > { %v1680_v60 = vmul.f32 %v3119_v59, %v3117_v58 }
 0xbad   : > { %2940 = vmatpush3.msra.mxu1 %v1680_v60  ;;  %v2765_v60 = vld [vmem:[%s3722_s5 + $0x78] sm:$0xff] }
 0xbae   : > { %2942 = vmatmul.mubr.msk.f32.vlgmr.msra.gmra.mrb[0].mxu1 %vm560_vm3, %v2719_v61  ;;  %2965 = vmatprep.subr.mxu1 %v3196_v0  ;;  %v2766_v61 = vld [vmem:[%s3722_s5 + $0x80] sm:$0xff] }
 0xbaf   : > { %2944 = vmatprep.mubr.msk.f32.mxu1 %vm3197_vm0, %v3196_v0 }
 0xbb2   : > { %2945 = vmatmul.mubr.msk.f32.gmra.mrb[2].mxu1 %vm560_vm3, %v2720_v62  ;;  %v2767_v62 = vld [vmem:[%s3722_s5 + $0x88] sm:$0xf] }
 0xbb3   : > { %2947 = vmatprep.mubr.msk.f32.mxu1 %vm3197_vm0, %v3196_v0 }
 0xbb6   : > { %2948 = vmatmul.mubr.msk.f32.gmra.mrb[10].mxu1 %vm560_vm3, %v2721_v63  ;;  %v548_v63 = vpop.permute.xlu0 %547 }
 0xbb7   : > { %2967 = vmatprep.mubr.msk.f32.mxu1 %vm3197_vm0, %v3196_v0 }
 0xc89   : > { %v1789_v2 = vpop.f32.mrb[10].mxu1 }
 0xc8a   : > { %v1790_v3 = vadd.f32 %v1789_v2, %v1702_v1  ;;  %v2949_v4 = vpop.f32.mrb[11].mxu1  ;;  %v930_v2 = vpop.permute.xlu0 %929 }
 0xc8c   : > { %v1795_v5 = vadd.f32 %v1790_v3, %v1414_v40  ;;  %v2746_v40 = vld [vmem:[%s3723_s6 + $0x68] sm:$0xff] }
 0xc8e   : > { %1796 = vrot.lane.b32.xlu1 %v1795_v5, %s3200_s18  ;;  %2951 = vmatpush3.msk.msra.mxu0 %vm283_vm1, %v1795_v5  ;;  %v1311_v4 = vpop.permute.xlu0 %1310  ;;  %s269_s18 = scalar_lea.vmem [#allocation2], %s2646_s8 }
 0xc8f   : > { %2953 = vmatmul.mubr.msk.f32.vlgmr.msra.gmra.mrb[16].mxu0 %vm279_vm2, %v2729_v6  ;;  %2955 = vmatprep.subr.mxu0 %v3196_v0  ;;  %v3002_v6 = vadd.f32 %v930_v2, %v548_v63  ;;  %s2580_s9 = sshll.u32 %s269_s18, 4  ;;  %s3669_s9 = int_to_ptr.vmem [resolvable:$true] %s2580_s9 }
 0xc90   : > { %2957 = vmatprep.mubr.msk.f32.mxu0 %vm3197_vm0, %v3196_v0  ;;  %s3132_s17 = scalar_lea.vmem %s3669_s9, 256  ;;  %p3139_p0 = scmp.lt.s32.totalorder %s3669_s9, %s3137_s19 }
 0xc91   : > { %p3133_p11 = scmp.ne.s32.totalorder %s3669_s9, %s3132_s17  ;;  %p3140_p1 = scmp.lt.s32.totalorder %s3138_s21, %s3132_s17 }
 0xc92   : > { %1962 = vperm.xlu1 %3095, %v2736_v7   ;;  %v1692_v7 = vpop.permute.xlu0 %1691 }
 0xc93   : > { %p3134_p12 = pnand %p3133_p11, %p3284_p5  ;;  %p3141_p2 = por %p3140_p1, %p3139_p0 }
 0xc95   : > { %p3135_p13 = pneg %p3134_p12 }
 0xc97   : > { %p3142_p3 = pnand %p3141_p2, %p3135_p13 }
 0xd00   : > { %v1797_v9 = vpop.permute.xlu1 %1796 }
 0xd01   : > { %2956 = vmatpush3.msk.msra.mxu0 %vm283_vm1, %v1797_v9 }
 0xd02   : > { %2958 = vmatmul.mubr.msk.f32.vlgmr.msra.gmra.mrb[16].mxu0 %vm279_vm2, %v2728_v8  ;;  %v3003_v8 = vadd.f32 %v3002_v6, %v1311_v4 }
 0xd03   : > { %2962 = vmatprep.mubr.msk.f32.mxu0 %vm279_vm2, %v2734_v10  ;;  %v2073_v10 = vpop.permute.xlu0 %2072 }
 0xd11   : > { %v1963_v19 = vpop.permute.xlu1 %1962 }
 0xdd5   : > { %v1950_v11 = vpop.f32.mrb[16].mxu0 }
 0xdd6   : > { %v2959_v13 = vpop.f32.mrb[17].mxu0  ;;  %2960 = vmatprep.subr.msk.mxu0 %vm283_vm1, %v1950_v11 }
 0xdd7   : > { %2961 = vmatpush3.msk.msra.mxu0 %vm283_vm1, %v1950_v11  ;;  %v3004_v11 = vadd.f32 %v3003_v8, %v1692_v7 }
 0xdd8   : > { %2963 = vmatmul.mubr.msk.f32.vlgmr.msra.gmra.mrb[18].mxu0 %vm279_vm2, %v2735_v12  ;;  %2976 = vmatprep.subr.mxu0 %v3196_v0 }
 0xdd9   : > { %2978 = vmatprep.mubr.msk.f32.mxu0 %vm3197_vm0, %v3196_v0 }
 0xeab   : > { %v2964_v15 = vpop.f32.mrb[18].mxu0 }
 0xeac   : > { %v2051_v16 = vadd.f32 %v2964_v15, %v1968_v14  ;;  %v2045_v17 = vpop.f32.mrb[19].mxu0  ;;  %v2454_v14 = vpop.permute.xlu0 %2453 }
 0xead   : > { %v2046_v20 = vadd.f32 %v2045_v17, %v1963_v19 }
 0xeae   : > { %v2741_v18 = vmul.f32 -1.442695, %v2051_v16 }
 0xeb0   : > { %3120 = vpow2.f32 %v2741_v18 }
 0xeb1   : > { %3122 = vtanh.f32 %v2046_v20 }
 0xeba   : > { %v3121_v21 = vpop.eup %3120 }
 0xebb   : > { %v2058_v22 = vadd.f32 1.0, %v3121_v21  ;;  %v3123_v23 = vpop.eup %3122 }
 0xebd   : > { %3124 = vrcp.f32 %v2058_v22 }
 0xec7   : > { %v3125_v24 = vpop.eup %3124 }
 0xec8   : > { %v2061_v25 = vmul.f32 %v3125_v24, %v3123_v23 }
 0xeca   : > { %2966 = vmatpush3.msra.mxu1 %v2061_v25 }
 0xecb   : > { %2968 = vmatmul.mubr.msk.f32.vlgmr.msra.gmra.mrb[0].mxu1 %vm560_vm3, %v2742_v26  ;;  %2991 = vmatprep.subr.mxu1 %v3196_v0 }
 0xecc   : > { %2970 = vmatprep.mubr.msk.f32.mxu1 %vm3197_vm0, %v3196_v0 }
 0xecf   : > { %2971 = vmatmul.mubr.msk.f32.gmra.mrb[2].mxu1 %vm560_vm3, %v2743_v27 }
 0xed0   : > { %2973 = vmatprep.mubr.msk.f32.mxu1 %vm3197_vm0, %v3196_v0 }
 0xed3   : > { %2974 = vmatmul.mubr.msk.f32.gmra.mrb[12].mxu1 %vm560_vm3, %v2744_v28 }
 0xed4   : > { %2993 = vmatprep.mubr.msk.f32.mxu1 %vm3197_vm0, %v3196_v0 }
 0xfa6   : > { %v2170_v30 = vpop.f32.mrb[12].mxu1 }
 0xfa7   : > { %v2171_v31 = vadd.f32 %v2170_v30, %v2083_v29  ;;  %v2975_v32 = vpop.f32.mrb[13].mxu1 }
 0xfa9   : > { %v2176_v33 = vadd.f32 %v2171_v31, %v1795_v5 }
 0xfab   : > { %2177 = vrot.lane.b32.xlu1 %v2176_v33, %s3201_s29  ;;  %2977 = vmatpush3.msk.msra.mxu0 %vm283_vm1, %v2176_v33 }
 0xfac   : > { %2979 = vmatmul.mubr.msk.f32.vlgmr.msra.gmra.mrb[20].mxu0 %vm279_vm2, %v2752_v34  ;;  %2981 = vmatprep.subr.mxu0 %v3196_v0 }
 0xfad   : > { %2983 = vmatprep.mubr.msk.f32.mxu0 %vm3197_vm0, %v3196_v0 }
 0xfaf   : > { %2343 = vperm.xlu1 %3095, %v2759_v35  }
 0xfb3   : > { %552 = vperm.xlu1 %3095, %v543_v36  }
 0xfb7   : > { %934 = vperm.xlu1 %3095, %v2677_v37  }
 0xfbb   : > { %1315 = vperm.xlu1 %3095, %v2700_v38  }
 0xfbf   : > { %1696 = vperm.xlu1 %3095, %v2723_v39  }
 0xfc3   : > { %2077 = vperm.xlu1 %3095, %v2746_v40  }
 0xfc7   : > { %2458 = vperm.xlu1 %3095, %v2769_v41  }
0x101d   : > { %v2178_v43 = vpop.permute.xlu1 %2177 }
0x101e   : > { %2982 = vmatpush3.msk.msra.mxu0 %vm283_vm1, %v2178_v43 }
0x101f   : > { %2984 = vmatmul.mubr.msk.f32.vlgmr.msra.gmra.mrb[20].mxu0 %vm279_vm2, %v2751_v42 }
0x1020   : > { %2988 = vmatprep.mubr.msk.f32.mxu0 %vm279_vm2, %v2757_v44 }
0x102e   : > { %v2344_v53 = vpop.permute.xlu1 %2343 }
0x1032   : > { %v553_v1 = vpop.permute.xlu1 %552 }
0x1036   : > { %v935_v3 = vpop.permute.xlu1 %934 }
0x1037   : > { %v3008_v13 = vadd.f32 %v935_v3, %v553_v1 }
0x103a   : > { %v1316_v5 = vpop.permute.xlu1 %1315 }
0x103b   : > { %v3009_v15 = vadd.f32 %v3008_v13, %v1316_v5 }
0x103e   : > { %v1697_v9 = vpop.permute.xlu1 %1696 }
0x103f   : > { %v3010_v17 = vadd.f32 %v3009_v15, %v1697_v9 }
0x1042   : > { %v2078_v12 = vpop.permute.xlu1 %2077 }
0x1043   : > { %v3011_v20 = vadd.f32 %v3010_v17, %v2078_v12 }
0x1046   : > { %v2459_v18 = vpop.permute.xlu1 %2458 }
0x1047   : > { %v3012_v23 = vadd.f32 %v3011_v20, %v2459_v18 }
0x10f2   : > { %v2331_v45 = vpop.f32.mrb[20].mxu0 }
0x10f3   : > { %v2985_v47 = vpop.f32.mrb[21].mxu0  ;;  %2986 = vmatprep.subr.msk.mxu0 %vm283_vm1, %v2331_v45 }
0x10f4   : > { %2987 = vmatpush3.msk.msra.mxu0 %vm283_vm1, %v2331_v45 }
0x10f5   : > { %2989 = vmatmul.mubr.msk.f32.vlgmr.msra.gmra.mrb[22].mxu0 %vm279_vm2, %v2758_v46 }
0x11c8   : > { %v2990_v49 = vpop.f32.mrb[22].mxu0 }
0x11c9   : > { %v2432_v50 = vadd.f32 %v2990_v49, %v2349_v48  ;;  %v2426_v51 = vpop.f32.mrb[23].mxu0 }
0x11ca   : > { %v2427_v54 = vadd.f32 %v2426_v51, %v2344_v53 }
0x11cb   : > { %v2764_v52 = vmul.f32 -1.442695, %v2432_v50 }
0x11cd   : > { %3126 = vpow2.f32 %v2764_v52 }
0x11ce   : > { %3128 = vtanh.f32 %v2427_v54 }
0x11d7   : > { %v3127_v55 = vpop.eup %3126 }
0x11d8   : > { %v2439_v56 = vadd.f32 1.0, %v3127_v55  ;;  %v3129_v57 = vpop.eup %3128 }
0x11da   : > { %3130 = vrcp.f32 %v2439_v56 }
0x11e4   : > { %v3131_v58 = vpop.eup %3130 }
0x11e5   : > { %v2442_v59 = vmul.f32 %v3131_v58, %v3129_v57 }
0x11e7   : > { %2992 = vmatpush3.msra.mxu1 %v2442_v59 }
0x11e8   : > { %2994 = vmatmul.mubr.msk.f32.vlgmr.msra.gmra.mrb[0].mxu1 %vm560_vm3, %v2765_v60 }
0x11e9   : > { %2996 = vmatprep.mubr.msk.f32.mxu1 %vm3197_vm0, %v3196_v0 }
0x11ec   : > { %2997 = vmatmul.mubr.msk.f32.gmra.mrb[2].mxu1 %vm560_vm3, %v2766_v61 }
0x11ed   : > { %2999 = vmatprep.mubr.msk.f32.mxu1 %vm3197_vm0, %v3196_v0  ;;  %v3005_v0 = vadd.f32 %v3004_v11, %v2073_v10 }
0x11ef   : > { %v3006_v16 = vadd.f32 %v3005_v0, %v2454_v14 }
0x11f0   : > { %3000 = vmatmul.mubr.msk.f32.gmra.mrb[14].mxu1 %vm560_vm3, %v2767_v62 }
0x12bb   : > { %v2540_v19 = vpop.f32.mrb[0].mxu1 }
0x12bc   : > { %v3007_v21 = vadd.f32 %v3006_v16, %v2540_v19  ;;  %v2995_v22 = vpop.f32.mrb[1].mxu1 }
0x12be   : > { %2557 = vrot.lane.b32.xlu0 %v3007_v21, %s3202_s22 }
0x12bf   : > { %v2545_v24 = vpop.f32.mrb[2].mxu1 }
0x12c0   : > { %v3013_v25 = vadd.f32 %v3012_v23, %v2545_v24  ;;  %v2998_v26 = vpop.f32.mrb[3].mxu1 }
0x12c2   : > { %2559 = vrot.lane.b32.xlu1 %v3013_v25, %s3202_s22 }
0x12c3   : > { %v2550_v27 = vpop.f32.mrb[14].mxu1 }
0x12c4   : > { %v3001_v28 = vpop.f32.mrb[15].mxu1 }
0x1330   : > { %v2558_v29 = vpop.permute.xlu0 %2557 }
0x1331   : > { %2564 = vst.msk [vmem:[%s269_s18] sm:$0xff] %vm2563_vm4, %v2558_v29 }
0x1334   : > { %v2560_v30 = vpop.permute.xlu1 %2559 }
0x1335   : > { %2565 = vst.msk [vmem:[%s269_s18 + $0x8] sm:$0xff] %vm2563_vm4, %v2560_v30 }
0x1336   : > { %3145 = shalt.err (!%p3142_p3)
}
0x1337   : > { %s3146_s20 = scalar_lea.hbm %s3674_s15, 256  ;;  %s3150_s8 = scalar_lea.hbm %s3724_s7, 512 }
0x1338   : > { %p3147_p4 = scmp.ne.s32.totalorder %s3674_s15, %s3146_s20  ;;  %p3151_p9 = scmp.lt.u32.totalorder %s3674_s15, %s3724_s7 }
0x1339   : > { %p3152_p10 = scmp.lt.u32.totalorder %s3150_s8, %s3146_s20  ;;  %p3154_p12 = scmp.lt.u32.totalorder %s3146_s20, %s3674_s15 }
0x133a   : > { %p3148_p7 = pnand %p3147_p4, %p3284_p5 }
0x133b   : > { %p3153_p11 = por %p3152_p10, %p3151_p9 }
0x133c   : > { %p3149_p8 = pneg %p3148_p7 }
0x133d   : > { %p3155_p13 = por %p3154_p12, %p3153_p11 }
0x133f   : > { %p3156_p0 = pnand %p3155_p13, %p3149_p8 }
0x1341   : > { %3159 = shalt.err (!%p3156_p0)
}
0x1342   : > { %s3204_s29 = smov 128   ;;  %s3205_s14 = smov 8  }
0x1343   : > { %3046 = dma.vmem_to_hbm [thread:$0]  (%p3284_p5), %s3669_s9, 256, %s3674_s15, %s3676_s16, %s3204_s29, %s3204_s29, %s3205_s14  }
0x1344 PF: > { %p3052_p1 = scmp.ge.s32.totalorder %s3194_s27, 2  ;;  %s2595_s17 = sand.u32 1, %s3182_s24  }
0x1345   : > { %s2596_s28 = scalar_lea.sflag [#allocation3], %s2595_s17 }
0x1346   : > { %p3049_p2 = pnand %p3052_p1, %p3288_p6 }
0x1348   : > { %3177 = dma.done.wait (!%p3049_p2), %s2596_s28, 256  }
0x1349   : > { %3179 = vsyncadd (!%p3049_p2), %s2596_s28, 4294967040  ;;  %p17_p3 = scmp.ge.s32.totalorder %s3271_s30, 4   ;;  %s3727_s24 = smov %s3186_s25 }
0x134a   : > { %s3728_s25 = smov %s3190_s26  ;;  %s3729_s26 = smov %s3282_s10 }
0x134b   : > { %s3730_s27 = smov %s3271_s30  ;;  %19 = sbr.rel (!%p17_p3) target bundleno = 3 (0x3), region = 113 }
0x1352   :  { %2601 = vsyncpa [#allocation3], 1 }
0x1353   :  { %2603 = vsyncpa [#allocation3 + $0x1], 1 }

</bundles_post_ra>
